<compile_context>
chip_gen: v7x
topology: tpu7x:2x2x1
jax: 0.10.0
libtpu: 0.0.40
codegen_flags: <defaults>
</compile_context>

<pallas_src>
import functools
import math

import jax
import jax.numpy as jnp
from jax.experimental import pallas as pl
from jax.experimental.pallas import tpu as pltpu

_LAYER_KEYS = ("in_w", "in_b", "out_w", "out_b", "ln1_g", "ln1_b",
               "l1_w", "l1_b", "l2_w", "l2_b", "ln2_g", "ln2_b")

# 32 MiB: bumps v5e's 16 MiB scoped-VMEM default (double-buffered stacked layer
# weights are ~21 MiB at full size) while staying within v7x's 64 MiB physical.
_VMEM_LIMIT = 32 * 1024 * 1024


def _round_up(x, m):
    return ((x + m - 1) // m) * m


def _num_tensorcores():
    """Best-effort TensorCore count (v7x has 2 per chip). Falls back to 1."""
    try:
        kind = jax.devices()[0].device_kind.lower()
    except Exception:
        return 1
    return 2 if "v7" in kind else 1


def _choose_k_tile(k_dim, cap=4096):
    """Pick a K tile (multiple of 128, <= cap) and the padded K it divides.

    Prefers an exact divisor of k_dim with >= 2 grid steps (pipelining, no
    padding); otherwise pads K up to a multiple of the tile (ragged-K path).
    cap=4096 keeps a bf16 (tk, 768) weight tile ~6 MiB so double-buffered tiles
    fit v7x's 32 MiB scoped VMEM as well as v5e/v6e.
    """
    best, best_multi = None, None
    for m in range(128, min(k_dim, cap) + 1, 128):
        if k_dim % m == 0:
            best = m
            if k_dim // m >= 2:
                best_multi = m
    if best_multi is not None:
        return best_multi, k_dim
    if best is not None:
        return best, k_dim
    tk = min(cap, _round_up(k_dim, 128))
    return tk, _round_up(k_dim, tk)


# ----------------------------------------------------------------------------
# Kernel 1: K-tiled image projection (CLIP image-encoder stub) + token assembly
# ----------------------------------------------------------------------------
def _embed_kernel(x_ref, w_ref, b_ref, txt_ref, pv_ref, o_ref, acc_ref):
    k = pl.program_id(1)

    @pl.when(k == 0)
    def _init():
        acc_ref[...] = jnp.zeros_like(acc_ref)

    # bf16 x bf16 -> f32 accumulate on the MXU; weight tile streams from HBM.
    acc_ref[...] += jnp.dot(x_ref[...].astype(jnp.bfloat16), w_ref[...],
                            preferred_element_type=jnp.float32)

    @pl.when(k == pl.num_programs(1) - 1)
    def _finalize():
        bsz, tn = acc_ref.shape
        img = acc_ref[...] + b_ref[...]                 # (B, tn) image token
        txt = txt_ref[...] + pv_ref[...]                # (2, tn) text + prompt
        # rows ordered (s, b): s=0 image, s=1 "Real", s=2 "Fake".
        # Direct segment stores (no concatenate temporary).
        o_ref[0:bsz, :] = img
        o_ref[bsz:2 * bsz, :] = jnp.broadcast_to(txt[0:1, :], (bsz, tn))
        o_ref[2 * bsz:3 * bsz, :] = jnp.broadcast_to(txt[1:2, :], (bsz, tn))


def embed_and_assemble(x_flat, params, *, num_tc):
    bsz, k_dim = x_flat.shape
    d = params["b_img"].shape[1]
    k_pad = params["w_img"].shape[0]
    if k_pad != k_dim:
        x_flat = jnp.pad(x_flat, ((0, 0), (0, k_pad - k_dim)))
    tk, _ = _choose_k_tile(k_pad)

    # v7x: split D across the two TensorCores ("parallel" leading axis); on
    # single-TC chips keep one chunk so the K loop stays as short as possible.
    d_chunks = 2 if (num_tc >= 2 and d % 256 == 0) else 1
    tn = d // d_chunks
    grid = (d_chunks, k_pad // tk)

    cost = pl.CostEstimate(
        flops=2 * bsz * k_pad * d,
        transcendentals=0,
        bytes_accessed=k_pad * d * 2 + bsz * k_pad * 4 + 3 * bsz * d * 4 + 4 * d * 4,
    )
    return pl.pallas_call(
        _embed_kernel,
        out_shape=jax.ShapeDtypeStruct((3 * bsz, d), jnp.float32),
        grid_spec=pltpu.PrefetchScalarGridSpec(
            num_scalar_prefetch=0,
            grid=grid,
            in_specs=[
                pl.BlockSpec((bsz, tk), lambda n, k: (0, k)),   # image pixels
                pl.BlockSpec((tk, tn), lambda n, k: (k, n)),    # bf16 weight stream
                pl.BlockSpec((1, tn), lambda n, k: (0, n)),     # bias
                pl.BlockSpec((2, tn), lambda n, k: (0, n)),     # text features
                pl.BlockSpec((1, tn), lambda n, k: (0, n)),     # prompt vector
            ],
            out_specs=pl.BlockSpec((3 * bsz, tn), lambda n, k: (0, n)),
            scratch_shapes=[pltpu.VMEM((bsz, tn), jnp.float32)],
        ),
        compiler_params=pltpu.CompilerParams(
            dimension_semantics=("parallel", "arbitrary"),
            vmem_limit_bytes=_VMEM_LIMIT),
        cost_estimate=cost,
    )(x_flat, params["w_img"], params["b_img"],
      params["text_features"], params["prompt_vector"])


# ----------------------------------------------------------------------------
# Kernel 2: fused encoder stack (all layers in one grid) + fc/sigmoid head
# ----------------------------------------------------------------------------
def _layernorm(s, g, b, eps=1e-5):
    mu = jnp.mean(s, axis=-1, keepdims=True)
    var = jnp.mean(jnp.square(s - mu), axis=-1, keepdims=True)
    return (s - mu) * jax.lax.rsqrt(var + eps) * g + b


def _encoder_stack_kernel(x_in_ref,
                          in_w, in_b, out_w, out_b, ln1_g, ln1_b,
                          l1_w, l1_b, l2_w, l2_b, ln2_g, ln2_b,
                          fc_w, fc_b,
                          o_ref, x_sc, *, num_heads, batch, num_layers):
    layer = pl.program_id(0)
    last = num_layers - 1

    @pl.when(layer == 0)
    def _load():
        x_sc[...] = x_in_ref[...]          # activations carried in VMEM scratch

    x = x_sc[...]                          # (N, D), rows ordered (s, b)
    n, d = x.shape
    dh = d // num_heads

    # ---- multi-head self-attention (Q scale folded into in_w) ----
    qkv = jnp.dot(x.astype(jnp.bfloat16), in_w[...],
                  preferred_element_type=jnp.float32) + in_b[...]
    q = qkv[:, :d]
    k = qkv[:, d:2 * d]
    v = qkv[:, 2 * d:]

    # Rows of the same batch element are r = s*B + b, so b = r % B.
    row_b = jax.lax.broadcasted_iota(jnp.int32, (n, n), 0) % batch
    col_b = jax.lax.broadcasted_iota(jnp.int32, (n, n), 1) % batch
    batch_bias = jnp.where(row_b == col_b, 0.0, -1e30).astype(jnp.float32)

    # Per-head dh-column slices (contract over dh, not full D).
    # TODO(synk): switch to lax.fori_loop with pl.ds head slices if N=3B >= 256
    # to bound live ranges of the (N,N) score temporaries.
    head_outs = []
    for h in range(num_heads):
        qh = q[:, h * dh:(h + 1) * dh]
        kh = k[:, h * dh:(h + 1) * dh]
        vh = v[:, h * dh:(h + 1) * dh]
        s = jax.lax.dot_general(qh, kh, (((1,), (1,)), ((), ())),
                                preferred_element_type=jnp.float32) + batch_bias
        m = jnp.max(s, axis=-1, keepdims=True)
        p = jnp.exp(s - m)
        denom = jnp.sum(p, axis=-1, keepdims=True)
        attn = p * pl.reciprocal(denom)    # exact reciprocal for parity
        head_outs.append(jnp.dot(attn, vh, preferred_element_type=jnp.float32))
    ao = jnp.concatenate(head_outs, axis=-1)

    attn_out = jnp.dot(ao.astype(jnp.bfloat16), out_w[...],
                       preferred_element_type=jnp.float32) + out_b[...]
    x1 = _layernorm(x + attn_out, ln1_g[...], ln1_b[...])

    def ffn_ln2(z):
        ff = jnp.dot(z.astype(jnp.bfloat16), l1_w[...],
                     preferred_element_type=jnp.float32) + l1_b[...]
        ff = jnp.maximum(ff, 0.0)
        ff = jnp.dot(ff.astype(jnp.bfloat16), l2_w[...],
                     preferred_element_type=jnp.float32) + l2_b[...]
        return _layernorm(z + ff, ln2_g[...], ln2_b[...])

    @pl.when(layer != last)
    def _mid_layer():
        x_sc[...] = ffn_ln2(x1)

    @pl.when(layer == last)
    def _head_layer():
        # Only token 0 (rows 0..B-1) feeds fc, so run FFN/LN2 on those rows only.
        y = ffn_ln2(x1[0:batch, :])
        # fc weight is padded to 128 output lanes so the store is lane-dense;
        # the wrapper slices column 0.
        logits = jnp.dot(y.astype(jnp.bfloat16), fc_w[...],
                         preferred_element_type=jnp.float32) + fc_b[...]
        o_ref[...] = jax.nn.sigmoid(logits)


def encoder_stack(x, sp, fc_w, fc_b, *, num_heads, batch):
    n, d = x.shape
    f = sp["l1_w"].shape[-1]
    num_layers = sp["in_w"].shape[0]
    dh = d // num_heads

    in_specs = [pl.BlockSpec((n, d), lambda l: (0, 0))]            # x (resident)
    for key in _LAYER_KEYS:                                        # stacked (L, r, c)
        r, c = sp[key].shape[1:]
        in_specs.append(pl.BlockSpec((None, r, c), lambda l: (l, 0, 0)))
    in_specs += [pl.BlockSpec(fc_w.shape, lambda l: (0, 0)),       # fc (resident)
                 pl.BlockSpec(fc_b.shape, lambda l: (0, 0))]

    flops = num_layers * (2 * n * d * 3 * d                  # qkv proj
                          + num_heads * 4 * n * n * dh       # scores + pv
                          + 2 * n * d * d                    # out proj
                          + 4 * n * d * f)                   # ffn
    bytes_w = num_layers * 2 * (d * 3 * d + d * d + 2 * d * f)
    cost = pl.CostEstimate(
        flops=flops,
        transcendentals=num_layers * num_heads * n * n + batch,
        bytes_accessed=bytes_w + n * d * 4 + batch * fc_w.shape[1] * 4)

    # TODO(synk): on v7x, additionally shard the token rows over a "parallel"
    # batch-chunk axis so the layer compute uses both TensorCores.
    return pl.pallas_call(
        functools.partial(_encoder_stack_kernel, num_heads=num_heads,
                          batch=batch, num_layers=num_layers),
        out_shape=jax.ShapeDtypeStruct((batch, fc_w.shape[1]), jnp.float32),
        grid_spec=pltpu.PrefetchScalarGridSpec(
            num_scalar_prefetch=0,
            grid=(num_layers,),
            in_specs=in_specs,
            out_specs=pl.BlockSpec((batch, fc_w.shape[1]), lambda l: (0, 0)),
            scratch_shapes=[pltpu.VMEM((n, d), jnp.float32)],
        ),
        compiler_params=pltpu.CompilerParams(
            dimension_semantics=("arbitrary",),
            vmem_limit_bytes=_VMEM_LIMIT),
        cost_estimate=cost,
    )(x, *[sp[key] for key in _LAYER_KEYS], fc_w, fc_b)


# ----------------------------------------------------------------------------
# Parameters & forward
# ----------------------------------------------------------------------------
def init_params(key, *, prompt_dim, num_heads, num_layers, ffn_dim, image_flat_dim):
    assert prompt_dim % num_heads == 0
    d = prompt_dim
    dh = d // num_heads
    keys = iter(jax.random.split(key, 8 + 8 * num_layers))

    def nrm(shape, scale=0.02):
        return scale * jax.random.normal(next(keys), shape, dtype=jnp.float32)

    # Pad K (flattened image dim) so the embed kernel's K tiling always divides.
    _, k_pad = _choose_k_tile(image_flat_dim)
    w_img = nrm((image_flat_dim, d))
    if k_pad != image_flat_dim:
        w_img = jnp.pad(w_img, ((0, k_pad - image_flat_dim), (0, 0)))

    fc_w = nrm((d, 1))
    fc_w_pad = jnp.zeros((d, 128), jnp.float32).at[:, :1].set(fc_w).astype(jnp.bfloat16)
    fc_b_pad = jnp.zeros((1, 128), jnp.float32)

    params = {
        # CLIP stubs (deterministic, frozen). Weight stored bf16 for streaming.
        "w_img": w_img.astype(jnp.bfloat16),
        "b_img": jnp.zeros((1, d), jnp.float32),
        "text_features": jax.random.normal(next(keys), (2, d), jnp.float32),
        # learnable parts of PROMPTLEARNER:
        "prompt_vector": jax.random.normal(next(keys), (1, d), jnp.float32),
        "fc_w_pad": fc_w_pad,
        "fc_b_pad": fc_b_pad,
    }

    q_scale = 1.0 / math.sqrt(dh)
    layer_list = []
    for _ in range(num_layers):
        in_w = nrm((d, 3 * d))
        in_w = in_w.at[:, :d].multiply(q_scale)   # fold 1/sqrt(dh) into Q proj
        layer_list.append({
            "in_w": in_w.astype(jnp.bfloat16),
            "in_b": jnp.zeros((1, 3 * d), jnp.float32),
            "out_w": nrm((d, d)).astype(jnp.bfloat16),
            "out_b": jnp.zeros((1, d), jnp.float32),
            "ln1_g": jnp.ones((1, d), jnp.float32),
            "ln1_b": jnp.zeros((1, d), jnp.float32),
            "l1_w": nrm((d, ffn_dim)).astype(jnp.bfloat16),
            "l1_b": jnp.zeros((1, ffn_dim), jnp.float32),
            "l2_w": nrm((ffn_dim, d)).astype(jnp.bfloat16),
            "l2_b": jnp.zeros((1, d), jnp.float32),
            "ln2_g": jnp.ones((1, d), jnp.float32),
            "ln2_b": jnp.zeros((1, d), jnp.float32),
        })
    # Stack per-layer params along a leading L axis for the fused-layer grid.
    params["layers"] = {k: jnp.stack([lp[k] for lp in layer_list])
                        for k in _LAYER_KEYS}
    return params


def prompt_learner_forward(image, params, *, num_heads):
    b = image.shape[0]
    x_flat = image.reshape(b, -1)                         # NCHW -> (B, C*H*W)
    num_tc = _num_tensorcores()

    # Kernel 1: image projection + (S=3, B, D) token assembly, rows (s, b).
    x = embed_and_assemble(x_flat, params, num_tc=num_tc)  # (3*B, D)

    # Kernel 2: all encoder layers + fc/sigmoid head in one grid.
    head = encoder_stack(x, params["layers"],
                         params["fc_w_pad"], params["fc_b_pad"],
                         num_heads=num_heads, batch=b)     # (B, 128)
    return head[:, :1]                                     # sigmoid(fc(token0))


if __name__ == "__main__":
    # Small-shape demo consistent with the module structure
    # (real module: prompt_dim=768, nhead=8, dim_feedforward=2048, 224x224 imgs).
    PROMPT_DIM = 128
    NUM_HEADS = 8
    NUM_LAYERS = 2
    FFN_DIM = 256
    B, C, H, W = 2, 3, 16, 16

    key = jax.random.PRNGKey(0)
    pkey, ikey = jax.random.split(key)
    params = init_params(
        pkey,
        prompt_dim=PROMPT_DIM,
        num_heads=NUM_HEADS,
        num_layers=NUM_LAYERS,
        ffn_dim=FFN_DIM,
        image_flat_dim=C * H * W,
    )
    image = jax.random.normal(ikey, (B, C, H, W), dtype=jnp.float32)

    fwd = jax.jit(functools.partial(prompt_learner_forward, num_heads=NUM_HEADS))
    out = fwd(image, params)
    jax.block_until_ready(out)

    assert out.shape == (B, 1)
    assert bool(jnp.all(jnp.isfinite(out)))
    assert bool(jnp.all((out >= 0.0) & (out <= 1.0)))
    print("KERNEL_OK")
</pallas_src>

<mosaic_0001>
module attributes {stable_mosaic.version = 11 : i64} {
  func.func @_embed_kernel(%arg0: i32, %arg1: i32, %arg2: memref<2x384xf32, #tpu.memory_space<vmem>>, %arg3: memref<384x128xbf16, #tpu.memory_space<vmem>>, %arg4: memref<1x128xf32, #tpu.memory_space<vmem>>, %arg5: memref<2x128xf32, #tpu.memory_space<vmem>>, %arg6: memref<1x128xf32, #tpu.memory_space<vmem>>, %arg7: memref<6x128xf32, #tpu.memory_space<vmem>>, %arg8: memref<2x128xf32, #tpu.memory_space<vmem>>) attributes {dimension_semantics = [#tpu.dimension_semantics<parallel>, #tpu.dimension_semantics<arbitrary>], iteration_bounds = array<i64: 1, 2>, scalar_prefetch = 0 : i64, scratch_operands = 1 : i64, tpu.core_type = #tpu.core_type<tc>, window_params = [{transform_indices = @transform_0, window_bounds = array<i64: 2, 384>}, {transform_indices = @transform_1, window_bounds = array<i64: 384, 128>}, {transform_indices = @transform_2, window_bounds = array<i64: 1, 128>}, {transform_indices = @transform_3, window_bounds = array<i64: 2, 128>}, {transform_indices = @transform_4, window_bounds = array<i64: 1, 128>}, {transform_indices = @transform_5, window_bounds = array<i64: 6, 128>}]} {
    %c0_i32 = arith.constant 0 : i32
    %0 = arith.cmpi eq, %arg1, %c0_i32 : i32
    %1 = arith.extui %0 : i1 to i32
    %c0_i32_0 = arith.constant 0 : i32
    %2 = arith.cmpi ne, %1, %c0_i32_0 : i32
    scf.if %2 {
      %cst_9 = arith.constant 0.000000e+00 : f32
      %13 = vector.broadcast %cst_9 : f32 to vector<2x128xf32>
      %c0_10 = arith.constant 0 : index
      %c0_11 = arith.constant 0 : index
      %14 = vector.load %arg8[%c0_10, %c0_11] : memref<2x128xf32, #tpu.memory_space<vmem>>, vector<2x128xf32>
      tpu.vector_store %arg8[%c0_10, %c0_11], %13 {strides = array<i32>} : memref<2x128xf32, #tpu.memory_space<vmem>>, vector<2x128xf32>,
    } else {
    }
    %c0 = arith.constant 0 : index
    %c0_1 = arith.constant 0 : index
    %3 = vector.load %arg8[%c0, %c0_1] : memref<2x128xf32, #tpu.memory_space<vmem>>, vector<2x128xf32>
    %c0_2 = arith.constant 0 : index
    %c0_3 = arith.constant 0 : index
    %4 = vector.load %arg2[%c0_2, %c0_3] : memref<2x384xf32, #tpu.memory_space<vmem>>, vector<2x384xf32>
    %5 = arith.truncf %4 : vector<2x384xf32> to vector<2x384xbf16>
    %c0_4 = arith.constant 0 : index
    %c0_5 = arith.constant 0 : index
    %6 = vector.load %arg3[%c0_4, %c0_5] : memref<384x128xbf16, #tpu.memory_space<vmem>>, vector<384x128xbf16>
    %cst = arith.constant dense<0.000000e+00> : vector<2x128xf32>
    %7 = tpu.matmul %5, %6, %cst {dimension_numbers = #tpu.dot_dimension_numbers<[1], [0], [0], [1], [0, 0, 1, 1], [], []>} : vector<2x384xbf16>, vector<384x128xbf16>, vector<2x128xf32> -> vector<2x128xf32>
    %8 = arith.addf %3, %7 : vector<2x128xf32>
    %c0_6 = arith.constant 0 : index
    %c0_7 = arith.constant 0 : index
    %9 = vector.load %arg8[%c0_6, %c0_7] : memref<2x128xf32, #tpu.memory_space<vmem>>, vector<2x128xf32>
    tpu.vector_store %arg8[%c0_6, %c0_7], %8 {strides = array<i32>} : memref<2x128xf32, #tpu.memory_space<vmem>>, vector<2x128xf32>,
    %c1_i32 = arith.constant 1 : i32
    %10 = arith.cmpi eq, %arg1, %c1_i32 : i32
    %11 = arith.extui %10 : i1 to i32
    %c0_i32_8 = arith.constant 0 : i32
    %12 = arith.cmpi ne, %11, %c0_i32_8 : i32
    scf.if %12 {
      %c0_9 = arith.constant 0 : index
      %c0_10 = arith.constant 0 : index
      %13 = vector.load %arg8[%c0_9, %c0_10] : memref<2x128xf32, #tpu.memory_space<vmem>>, vector<2x128xf32>
      %c0_11 = arith.constant 0 : index
      %c0_12 = arith.constant 0 : index
      %14 = vector.load %arg4[%c0_11, %c0_12] : memref<1x128xf32, #tpu.memory_space<vmem>>, vector<1x128xf32>
      %15 = vector.broadcast %14 : vector<1x128xf32> to vector<2x128xf32>
      %16 = arith.addf %13, %15 : vector<2x128xf32>
      %c0_13 = arith.constant 0 : index
      %c0_14 = arith.constant 0 : index
      %17 = vector.load %arg5[%c0_13, %c0_14] : memref<2x128xf32, #tpu.memory_space<vmem>>, vector<2x128xf32>
      %c0_15 = arith.constant 0 : index
      %c0_16 = arith.constant 0 : index
      %18 = vector.load %arg6[%c0_15, %c0_16] : memref<1x128xf32, #tpu.memory_space<vmem>>, vector<1x128xf32>
      %19 = vector.broadcast %18 : vector<1x128xf32> to vector<2x128xf32>
      %20 = arith.addf %17, %19 : vector<2x128xf32>
      %c0_17 = arith.constant 0 : index
      %c0_18 = arith.constant 0 : index
      %21 = vector.load %arg7[%c0_17, %c0_18] : memref<6x128xf32, #tpu.memory_space<vmem>>, vector<2x128xf32>
      tpu.vector_store %arg7[%c0_17, %c0_18], %16 {strides = array<i32>} : memref<6x128xf32, #tpu.memory_space<vmem>>, vector<2x128xf32>,
      %22 = vector.extract_strided_slice %20 {offsets = [0, 0], sizes = [1, 128], strides = [1, 1]} : vector<2x128xf32> to vector<1x128xf32>
      %23 = vector.shape_cast %22 : vector<1x128xf32> to vector<1x128xf32>
      %24 = vector.broadcast %23 : vector<1x128xf32> to vector<2x128xf32>
      %c2 = arith.constant 2 : index
      %c0_19 = arith.constant 0 : index
      %25 = vector.load %arg7[%c2, %c0_19] : memref<6x128xf32, #tpu.memory_space<vmem>>, vector<2x128xf32>
      tpu.vector_store %arg7[%c2, %c0_19], %24 {strides = array<i32>} : memref<6x128xf32, #tpu.memory_space<vmem>>, vector<2x128xf32>,
      %26 = vector.extract_strided_slice %20 {offsets = [1, 0], sizes = [1, 128], strides = [1, 1]} : vector<2x128xf32> to vector<1x128xf32>
      %27 = vector.shape_cast %26 : vector<1x128xf32> to vector<1x128xf32>
      %28 = vector.broadcast %27 : vector<1x128xf32> to vector<2x128xf32>
      %c4 = arith.constant 4 : index
      %c0_20 = arith.constant 0 : index
      %29 = vector.load %arg7[%c4, %c0_20] : memref<6x128xf32, #tpu.memory_space<vmem>>, vector<2x128xf32>
      tpu.vector_store %arg7[%c4, %c0_20], %28 {strides = array<i32>} : memref<6x128xf32, #tpu.memory_space<vmem>>, vector<2x128xf32>,
    } else {
    }
    return
  }
  func.func @transform_0(%arg0: i32, %arg1: i32) -> (i32, i32) {
    %c0_i32 = arith.constant 0 : i32
    %c0_i32_0 = arith.constant 0 : i32
    return %c0_i32, %arg1 : i32, i32
  }
  func.func @transform_1(%arg0: i32, %arg1: i32) -> (i32, i32) {
    %c0_i32 = arith.constant 0 : i32
    return %arg1, %arg0 : i32, i32
  }
  func.func @transform_2(%arg0: i32, %arg1: i32) -> (i32, i32) {
    %c0_i32 = arith.constant 0 : i32
    %c0_i32_0 = arith.constant 0 : i32
    return %c0_i32, %arg0 : i32, i32
  }
  func.func @transform_3(%arg0: i32, %arg1: i32) -> (i32, i32) {
    %c0_i32 = arith.constant 0 : i32
    %c0_i32_0 = arith.constant 0 : i32
    return %c0_i32, %arg0 : i32, i32
  }
  func.func @transform_4(%arg0: i32, %arg1: i32) -> (i32, i32) {
    %c0_i32 = arith.constant 0 : i32
    %c0_i32_0 = arith.constant 0 : i32
    return %c0_i32, %arg0 : i32, i32
  }
  func.func @transform_5(%arg0: i32, %arg1: i32) -> (i32, i32) {
    %c0_i32 = arith.constant 0 : i32
    %c0_i32_0 = arith.constant 0 : i32
    return %c0_i32, %arg0 : i32, i32
  }
}

module attributes {stable_mosaic.version = 11 : i64} {
  func.func @_encoder_stack_kernel(%arg0: i32, %arg1: memref<6x128xf32, #tpu.memory_space<vmem>>, %arg2: memref<1x128x384xbf16, #tpu.memory_space<vmem>>, %arg3: memref<1x1x384xf32, #tpu.memory_space<vmem>>, %arg4: memref<1x128x128xbf16, #tpu.memory_space<vmem>>, %arg5: memref<1x1x128xf32, #tpu.memory_space<vmem>>, %arg6: memref<1x1x128xf32, #tpu.memory_space<vmem>>, %arg7: memref<1x1x128xf32, #tpu.memory_space<vmem>>, %arg8: memref<1x128x256xbf16, #tpu.memory_space<vmem>>, %arg9: memref<1x1x256xf32, #tpu.memory_space<vmem>>, %arg10: memref<1x256x128xbf16, #tpu.memory_space<vmem>>, %arg11: memref<1x1x128xf32, #tpu.memory_space<vmem>>, %arg12: memref<1x1x128xf32, #tpu.memory_space<vmem>>, %arg13: memref<1x1x128xf32, #tpu.memory_space<vmem>>, %arg14: memref<128x128xbf16, #tpu.memory_space<vmem>>, %arg15: memref<1x128xf32, #tpu.memory_space<vmem>>, %arg16: memref<2x128xf32, #tpu.memory_space<vmem>>, %arg17: memref<6x128xf32, #tpu.memory_space<vmem>>) attributes {dimension_semantics = [#tpu.dimension_semantics<arbitrary>], iteration_bounds = array<i64: 2>, scalar_prefetch = 0 : i64, scratch_operands = 1 : i64, tpu.core_type = #tpu.core_type<tc>, window_params = [{pipeline_mode = #tpu.pipeline_mode<synchronous>, transform_indices = @transform_0, window_bounds = array<i64: 6, 128>}, {transform_indices = @transform_1, window_bounds = array<i64: 1, 128, 384>}, {transform_indices = @transform_2, window_bounds = array<i64: 1, 1, 384>}, {transform_indices = @transform_3, window_bounds = array<i64: 1, 128, 128>}, {transform_indices = @transform_4, window_bounds = array<i64: 1, 1, 128>}, {transform_indices = @transform_5, window_bounds = array<i64: 1, 1, 128>}, {transform_indices = @transform_6, window_bounds = array<i64: 1, 1, 128>}, {transform_indices = @transform_7, window_bounds = array<i64: 1, 128, 256>}, {transform_indices = @transform_8, window_bounds = array<i64: 1, 1, 256>}, {transform_indices = @transform_9, window_bounds = array<i64: 1, 256, 128>}, {transform_indices = @transform_10, window_bounds = array<i64: 1, 1, 128>}, {transform_indices = @transform_11, window_bounds = array<i64: 1, 1, 128>}, {transform_indices = @transform_12, window_bounds = array<i64: 1, 1, 128>}, {pipeline_mode = #tpu.pipeline_mode<synchronous>, transform_indices = @transform_13, window_bounds = array<i64: 128, 128>}, {pipeline_mode = #tpu.pipeline_mode<synchronous>, transform_indices = @transform_14, window_bounds = array<i64: 1, 128>}, {pipeline_mode = #tpu.pipeline_mode<synchronous>, transform_indices = @transform_15, window_bounds = array<i64: 2, 128>}]} {
    %c0_i32 = arith.constant 0 : i32
    %0 = arith.cmpi eq, %arg0, %c0_i32 : i32
    %1 = arith.extui %0 : i1 to i32
    %c0_i32_0 = arith.constant 0 : i32
    %2 = arith.cmpi ne, %1, %c0_i32_0 : i32
    scf.if %2 {
      %c0_74 = arith.constant 0 : index
      %c0_75 = arith.constant 0 : index
      %223 = vector.load %arg1[%c0_74, %c0_75] : memref<6x128xf32, #tpu.memory_space<vmem>>, vector<6x128xf32>
      %c0_76 = arith.constant 0 : index
      %c0_77 = arith.constant 0 : index
      %224 = vector.load %arg17[%c0_76, %c0_77] : memref<6x128xf32, #tpu.memory_space<vmem>>, vector<6x128xf32>
      tpu.vector_store %arg17[%c0_76, %c0_77], %223 {strides = array<i32>} : memref<6x128xf32, #tpu.memory_space<vmem>>, vector<6x128xf32>,
    } else {
    }
    %c0 = arith.constant 0 : index
    %c0_1 = arith.constant 0 : index
    %3 = vector.load %arg17[%c0, %c0_1] : memref<6x128xf32, #tpu.memory_space<vmem>>, vector<6x128xf32>
    %4 = arith.truncf %3 : vector<6x128xf32> to vector<6x128xbf16>
    %c0_2 = arith.constant 0 : index
    %c0_3 = arith.constant 0 : index
    %c0_4 = arith.constant 0 : index
    %5 = vector.load %arg2[%c0_2, %c0_3, %c0_4] : memref<1x128x384xbf16, #tpu.memory_space<vmem>>, vector<1x128x384xbf16>
    %6 = vector.shape_cast %5 : vector<1x128x384xbf16> to vector<128x384xbf16>
    %cst = arith.constant dense<0.000000e+00> : vector<6x384xf32>
    %7 = tpu.matmul %4, %6, %cst {dimension_numbers = #tpu.dot_dimension_numbers<[1], [0], [0], [1], [0, 0, 1, 1], [], []>} : vector<6x128xbf16>, vector<128x384xbf16>, vector<6x384xf32> -> vector<6x384xf32>
    %c0_5 = arith.constant 0 : index
    %c0_6 = arith.constant 0 : index
    %c0_7 = arith.constant 0 : index
    %8 = vector.load %arg3[%c0_5, %c0_6, %c0_7] : memref<1x1x384xf32, #tpu.memory_space<vmem>>, vector<1x1x384xf32>
    %9 = vector.shape_cast %8 : vector<1x1x384xf32> to vector<1x384xf32>
    %10 = vector.broadcast %9 : vector<1x384xf32> to vector<6x384xf32>
    %11 = arith.addf %7, %10 : vector<6x384xf32>
    %12 = vector.extract_strided_slice %11 {offsets = [0, 0], sizes = [6, 128], strides = [1, 1]} : vector<6x384xf32> to vector<6x128xf32>
    %13 = vector.extract_strided_slice %11 {offsets = [0, 128], sizes = [6, 128], strides = [1, 1]} : vector<6x384xf32> to vector<6x128xf32>
    %14 = vector.extract_strided_slice %11 {offsets = [0, 256], sizes = [6, 128], strides = [1, 1]} : vector<6x384xf32> to vector<6x128xf32>
    %15 = tpu.iota {dimensions = array<i32: 0>} : vector<6x6xi32>
    %c2_i32 = arith.constant 2 : i32
    %c0_i32_8 = arith.constant 0 : i32
    %16 = arith.cmpi eq, %c2_i32, %c0_i32_8 : i32
    %c1_i32 = arith.constant 1 : i32
    %17 = arith.select %16, %c1_i32, %c2_i32 : i32
    %18 = vector.broadcast %17 : i32 to vector<6x6xi32>
    %19 = arith.remsi %15, %18 : vector<6x6xi32>
    %c0_i32_9 = arith.constant 0 : i32
    %20 = vector.broadcast %c0_i32_9 : i32 to vector<6x6xi32>
    %21 = arith.cmpi ne, %19, %20 : vector<6x6xi32>
    %c0_i32_10 = arith.constant 0 : i32
    %22 = vector.broadcast %c0_i32_10 : i32 to vector<6x6xi32>
    %23 = arith.cmpi slt, %19, %22 : vector<6x6xi32>
    %c0_i32_11 = arith.constant 0 : i32
    %24 = arith.cmpi slt, %17, %c0_i32_11 : i32
    %25 = vector.broadcast %24 : i1 to vector<6x6xi1>
    %26 = vector.broadcast %25 : vector<6x6xi1> to vector<6x6xi1>
    %27 = arith.xori %23, %26 : vector<6x6xi1>
    %28 = arith.andi %27, %21 : vector<6x6xi1>
    %29 = vector.broadcast %17 : i32 to vector<6x6xi32>
    %30 = arith.addi %19, %29 : vector<6x6xi32>
    %31 = arith.select %28, %30, %19 : vector<6x6xi1>, vector<6x6xi32>
    %32 = tpu.iota {dimensions = array<i32: 1>} : vector<6x6xi32>
    %c2_i32_12 = arith.constant 2 : i32
    %c0_i32_13 = arith.constant 0 : i32
    %33 = arith.cmpi eq, %c2_i32_12, %c0_i32_13 : i32
    %c1_i32_14 = arith.constant 1 : i32
    %34 = arith.select %33, %c1_i32_14, %c2_i32_12 : i32
    %35 = vector.broadcast %34 : i32 to vector<6x6xi32>
    %36 = arith.remsi %32, %35 : vector<6x6xi32>
    %c0_i32_15 = arith.constant 0 : i32
    %37 = vector.broadcast %c0_i32_15 : i32 to vector<6x6xi32>
    %38 = arith.cmpi ne, %36, %37 : vector<6x6xi32>
    %c0_i32_16 = arith.constant 0 : i32
    %39 = vector.broadcast %c0_i32_16 : i32 to vector<6x6xi32>
    %40 = arith.cmpi slt, %36, %39 : vector<6x6xi32>
    %c0_i32_17 = arith.constant 0 : i32
    %41 = arith.cmpi slt, %34, %c0_i32_17 : i32
    %42 = vector.broadcast %41 : i1 to vector<6x6xi1>
    %43 = vector.broadcast %42 : vector<6x6xi1> to vector<6x6xi1>
    %44 = arith.xori %40, %43 : vector<6x6xi1>
    %45 = arith.andi %44, %38 : vector<6x6xi1>
    %46 = vector.broadcast %34 : i32 to vector<6x6xi32>
    %47 = arith.addi %36, %46 : vector<6x6xi32>
    %48 = arith.select %45, %47, %36 : vector<6x6xi1>, vector<6x6xi32>
    %49 = arith.cmpi eq, %31, %48 : vector<6x6xi32>
    %cst_18 = arith.constant 0.000000e+00 : f32
    %cst_19 = arith.constant -1.000000e+30 : f32
    %50 = vector.broadcast %cst_18 : f32 to vector<6x6xf32>
    %51 = vector.broadcast %cst_19 : f32 to vector<6x6xf32>
    %52 = arith.select %49, %50, %51 : vector<6x6xi1>, vector<6x6xf32>
    %53 = vector.extract_strided_slice %12 {offsets = [0, 0], sizes = [6, 16], strides = [1, 1]} : vector<6x128xf32> to vector<6x16xf32>
    %54 = vector.extract_strided_slice %13 {offsets = [0, 0], sizes = [6, 16], strides = [1, 1]} : vector<6x128xf32> to vector<6x16xf32>
    %55 = vector.extract_strided_slice %14 {offsets = [0, 0], sizes = [6, 16], strides = [1, 1]} : vector<6x128xf32> to vector<6x16xf32>
    %cst_20 = arith.constant dense<0.000000e+00> : vector<6x6xf32>
    %56 = tpu.matmul %53, %54, %cst_20 {dimension_numbers = #tpu.dot_dimension_numbers<[1], [1], [0], [0], [0, 0, 1, 0], [], []>} : vector<6x16xf32>, vector<6x16xf32>, vector<6x6xf32> -> vector<6x6xf32>
    %57 = arith.addf %56, %52 : vector<6x6xf32>
    %cst_21 = arith.constant dense<0xFF800000> : vector<6xf32>
    %58 = vector.multi_reduction <maximumf>, %57, %cst_21 [1] : vector<6x6xf32> to vector<6xf32>
    %59 = vector.shape_cast %58 : vector<6xf32> to vector<6x1xf32>
    %60 = vector.broadcast %59 : vector<6x1xf32> to vector<6x6xf32>
    %61 = arith.subf %57, %60 : vector<6x6xf32>
    %62 = math.exp %61 : vector<6x6xf32>
    %cst_22 = arith.constant dense<0.000000e+00> : vector<6xf32>
    %63 = vector.multi_reduction <add>, %62, %cst_22 [1] : vector<6x6xf32> to vector<6xf32>
    %64 = vector.shape_cast %63 : vector<6xf32> to vector<6x1xf32>
    %65 = tpu.reciprocal %64 : vector<6x1xf32> -> vector<6x1xf32>
    %66 = vector.broadcast %65 : vector<6x1xf32> to vector<6x6xf32>
    %67 = arith.mulf %62, %66 : vector<6x6xf32>
    %cst_23 = arith.constant dense<0.000000e+00> : vector<6x16xf32>
    %68 = tpu.matmul %67, %55, %cst_23 {dimension_numbers = #tpu.dot_dimension_numbers<[1], [0], [0], [1], [0, 0, 1, 1], [], []>} : vector<6x6xf32>, vector<6x16xf32>, vector<6x16xf32> -> vector<6x16xf32>
    %69 = vector.extract_strided_slice %12 {offsets = [0, 16], sizes = [6, 16], strides = [1, 1]} : vector<6x128xf32> to vector<6x16xf32>
    %70 = vector.extract_strided_slice %13 {offsets = [0, 16], sizes = [6, 16], strides = [1, 1]} : vector<6x128xf32> to vector<6x16xf32>
    %71 = vector.extract_strided_slice %14 {offsets = [0, 16], sizes = [6, 16], strides = [1, 1]} : vector<6x128xf32> to vector<6x16xf32>
    %cst_24 = arith.constant dense<0.000000e+00> : vector<6x6xf32>
    %72 = tpu.matmul %69, %70, %cst_24 {dimension_numbers = #tpu.dot_dimension_numbers<[1], [1], [0], [0], [0, 0, 1, 0], [], []>} : vector<6x16xf32>, vector<6x16xf32>, vector<6x6xf32> -> vector<6x6xf32>
    %73 = arith.addf %72, %52 : vector<6x6xf32>
    %cst_25 = arith.constant dense<0xFF800000> : vector<6xf32>
    %74 = vector.multi_reduction <maximumf>, %73, %cst_25 [1] : vector<6x6xf32> to vector<6xf32>
    %75 = vector.shape_cast %74 : vector<6xf32> to vector<6x1xf32>
    %76 = vector.broadcast %75 : vector<6x1xf32> to vector<6x6xf32>
    %77 = arith.subf %73, %76 : vector<6x6xf32>
    %78 = math.exp %77 : vector<6x6xf32>
    %cst_26 = arith.constant dense<0.000000e+00> : vector<6xf32>
    %79 = vector.multi_reduction <add>, %78, %cst_26 [1] : vector<6x6xf32> to vector<6xf32>
    %80 = vector.shape_cast %79 : vector<6xf32> to vector<6x1xf32>
    %81 = tpu.reciprocal %80 : vector<6x1xf32> -> vector<6x1xf32>
    %82 = vector.broadcast %81 : vector<6x1xf32> to vector<6x6xf32>
    %83 = arith.mulf %78, %82 : vector<6x6xf32>
    %cst_27 = arith.constant dense<0.000000e+00> : vector<6x16xf32>
    %84 = tpu.matmul %83, %71, %cst_27 {dimension_numbers = #tpu.dot_dimension_numbers<[1], [0], [0], [1], [0, 0, 1, 1], [], []>} : vector<6x6xf32>, vector<6x16xf32>, vector<6x16xf32> -> vector<6x16xf32>
    %85 = vector.extract_strided_slice %12 {offsets = [0, 32], sizes = [6, 16], strides = [1, 1]} : vector<6x128xf32> to vector<6x16xf32>
    %86 = vector.extract_strided_slice %13 {offsets = [0, 32], sizes = [6, 16], strides = [1, 1]} : vector<6x128xf32> to vector<6x16xf32>
    %87 = vector.extract_strided_slice %14 {offsets = [0, 32], sizes = [6, 16], strides = [1, 1]} : vector<6x128xf32> to vector<6x16xf32>
    %cst_28 = arith.constant dense<0.000000e+00> : vector<6x6xf32>
    %88 = tpu.matmul %85, %86, %cst_28 {dimension_numbers = #tpu.dot_dimension_numbers<[1], [1], [0], [0], [0, 0, 1, 0], [], []>} : vector<6x16xf32>, vector<6x16xf32>, vector<6x6xf32> -> vector<6x6xf32>
    %89 = arith.addf %88, %52 : vector<6x6xf32>
    %cst_29 = arith.constant dense<0xFF800000> : vector<6xf32>
    %90 = vector.multi_reduction <maximumf>, %89, %cst_29 [1] : vector<6x6xf32> to vector<6xf32>
    %91 = vector.shape_cast %90 : vector<6xf32> to vector<6x1xf32>
    %92 = vector.broadcast %91 : vector<6x1xf32> to vector<6x6xf32>
    %93 = arith.subf %89, %92 : vector<6x6xf32>
    %94 = math.exp %93 : vector<6x6xf32>
    %cst_30 = arith.constant dense<0.000000e+00> : vector<6xf32>
    %95 = vector.multi_reduction <add>, %94, %cst_30 [1] : vector<6x6xf32> to vector<6xf32>
    %96 = vector.shape_cast %95 : vector<6xf32> to vector<6x1xf32>
    %97 = tpu.reciprocal %96 : vector<6x1xf32> -> vector<6x1xf32>
    %98 = vector.broadcast %97 : vector<6x1xf32> to vector<6x6xf32>
    %99 = arith.mulf %94, %98 : vector<6x6xf32>
    %cst_31 = arith.constant dense<0.000000e+00> : vector<6x16xf32>
    %100 = tpu.matmul %99, %87, %cst_31 {dimension_numbers = #tpu.dot_dimension_numbers<[1], [0], [0], [1], [0, 0, 1, 1], [], []>} : vector<6x6xf32>, vector<6x16xf32>, vector<6x16xf32> -> vector<6x16xf32>
    %101 = vector.extract_strided_slice %12 {offsets = [0, 48], sizes = [6, 16], strides = [1, 1]} : vector<6x128xf32> to vector<6x16xf32>
    %102 = vector.extract_strided_slice %13 {offsets = [0, 48], sizes = [6, 16], strides = [1, 1]} : vector<6x128xf32> to vector<6x16xf32>
    %103 = vector.extract_strided_slice %14 {offsets = [0, 48], sizes = [6, 16], strides = [1, 1]} : vector<6x128xf32> to vector<6x16xf32>
    %cst_32 = arith.constant dense<0.000000e+00> : vector<6x6xf32>
    %104 = tpu.matmul %101, %102, %cst_32 {dimension_numbers = #tpu.dot_dimension_numbers<[1], [1], [0], [0], [0, 0, 1, 0], [], []>} : vector<6x16xf32>, vector<6x16xf32>, vector<6x6xf32> -> vector<6x6xf32>
    %105 = arith.addf %104, %52 : vector<6x6xf32>
    %cst_33 = arith.constant dense<0xFF800000> : vector<6xf32>
    %106 = vector.multi_reduction <maximumf>, %105, %cst_33 [1] : vector<6x6xf32> to vector<6xf32>
    %107 = vector.shape_cast %106 : vector<6xf32> to vector<6x1xf32>
    %108 = vector.broadcast %107 : vector<6x1xf32> to vector<6x6xf32>
    %109 = arith.subf %105, %108 : vector<6x6xf32>
    %110 = math.exp %109 : vector<6x6xf32>
    %cst_34 = arith.constant dense<0.000000e+00> : vector<6xf32>
    %111 = vector.multi_reduction <add>, %110, %cst_34 [1] : vector<6x6xf32> to vector<6xf32>
    %112 = vector.shape_cast %111 : vector<6xf32> to vector<6x1xf32>
    %113 = tpu.reciprocal %112 : vector<6x1xf32> -> vector<6x1xf32>
    %114 = vector.broadcast %113 : vector<6x1xf32> to vector<6x6xf32>
    %115 = arith.mulf %110, %114 : vector<6x6xf32>
    %cst_35 = arith.constant dense<0.000000e+00> : vector<6x16xf32>
    %116 = tpu.matmul %115, %103, %cst_35 {dimension_numbers = #tpu.dot_dimension_numbers<[1], [0], [0], [1], [0, 0, 1, 1], [], []>} : vector<6x6xf32>, vector<6x16xf32>, vector<6x16xf32> -> vector<6x16xf32>
    %117 = vector.extract_strided_slice %12 {offsets = [0, 64], sizes = [6, 16], strides = [1, 1]} : vector<6x128xf32> to vector<6x16xf32>
    %118 = vector.extract_strided_slice %13 {offsets = [0, 64], sizes = [6, 16], strides = [1, 1]} : vector<6x128xf32> to vector<6x16xf32>
    %119 = vector.extract_strided_slice %14 {offsets = [0, 64], sizes = [6, 16], strides = [1, 1]} : vector<6x128xf32> to vector<6x16xf32>
    %cst_36 = arith.constant dense<0.000000e+00> : vector<6x6xf32>
    %120 = tpu.matmul %117, %118, %cst_36 {dimension_numbers = #tpu.dot_dimension_numbers<[1], [1], [0], [0], [0, 0, 1, 0], [], []>} : vector<6x16xf32>, vector<6x16xf32>, vector<6x6xf32> -> vector<6x6xf32>
    %121 = arith.addf %120, %52 : vector<6x6xf32>
    %cst_37 = arith.constant dense<0xFF800000> : vector<6xf32>
    %122 = vector.multi_reduction <maximumf>, %121, %cst_37 [1] : vector<6x6xf32> to vector<6xf32>
    %123 = vector.shape_cast %122 : vector<6xf32> to vector<6x1xf32>
    %124 = vector.broadcast %123 : vector<6x1xf32> to vector<6x6xf32>
    %125 = arith.subf %121, %124 : vector<6x6xf32>
    %126 = math.exp %125 : vector<6x6xf32>
    %cst_38 = arith.constant dense<0.000000e+00> : vector<6xf32>
    %127 = vector.multi_reduction <add>, %126, %cst_38 [1] : vector<6x6xf32> to vector<6xf32>
    %128 = vector.shape_cast %127 : vector<6xf32> to vector<6x1xf32>
    %129 = tpu.reciprocal %128 : vector<6x1xf32> -> vector<6x1xf32>
    %130 = vector.broadcast %129 : vector<6x1xf32> to vector<6x6xf32>
    %131 = arith.mulf %126, %130 : vector<6x6xf32>
    %cst_39 = arith.constant dense<0.000000e+00> : vector<6x16xf32>
    %132 = tpu.matmul %131, %119, %cst_39 {dimension_numbers = #tpu.dot_dimension_numbers<[1], [0], [0], [1], [0, 0, 1, 1], [], []>} : vector<6x6xf32>, vector<6x16xf32>, vector<6x16xf32> -> vector<6x16xf32>
    %133 = vector.extract_strided_slice %12 {offsets = [0, 80], sizes = [6, 16], strides = [1, 1]} : vector<6x128xf32> to vector<6x16xf32>
    %134 = vector.extract_strided_slice %13 {offsets = [0, 80], sizes = [6, 16], strides = [1, 1]} : vector<6x128xf32> to vector<6x16xf32>
    %135 = vector.extract_strided_slice %14 {offsets = [0, 80], sizes = [6, 16], strides = [1, 1]} : vector<6x128xf32> to vector<6x16xf32>
    %cst_40 = arith.constant dense<0.000000e+00> : vector<6x6xf32>
    %136 = tpu.matmul %133, %134, %cst_40 {dimension_numbers = #tpu.dot_dimension_numbers<[1], [1], [0], [0], [0, 0, 1, 0], [], []>} : vector<6x16xf32>, vector<6x16xf32>, vector<6x6xf32> -> vector<6x6xf32>
    %137 = arith.addf %136, %52 : vector<6x6xf32>
    %cst_41 = arith.constant dense<0xFF800000> : vector<6xf32>
    %138 = vector.multi_reduction <maximumf>, %137, %cst_41 [1] : vector<6x6xf32> to vector<6xf32>
    %139 = vector.shape_cast %138 : vector<6xf32> to vector<6x1xf32>
    %140 = vector.broadcast %139 : vector<6x1xf32> to vector<6x6xf32>
    %141 = arith.subf %137, %140 : vector<6x6xf32>
    %142 = math.exp %141 : vector<6x6xf32>
    %cst_42 = arith.constant dense<0.000000e+00> : vector<6xf32>
    %143 = vector.multi_reduction <add>, %142, %cst_42 [1] : vector<6x6xf32> to vector<6xf32>
    %144 = vector.shape_cast %143 : vector<6xf32> to vector<6x1xf32>
    %145 = tpu.reciprocal %144 : vector<6x1xf32> -> vector<6x1xf32>
    %146 = vector.broadcast %145 : vector<6x1xf32> to vector<6x6xf32>
    %147 = arith.mulf %142, %146 : vector<6x6xf32>
    %cst_43 = arith.constant dense<0.000000e+00> : vector<6x16xf32>
    %148 = tpu.matmul %147, %135, %cst_43 {dimension_numbers = #tpu.dot_dimension_numbers<[1], [0], [0], [1], [0, 0, 1, 1], [], []>} : vector<6x6xf32>, vector<6x16xf32>, vector<6x16xf32> -> vector<6x16xf32>
    %149 = vector.extract_strided_slice %12 {offsets = [0, 96], sizes = [6, 16], strides = [1, 1]} : vector<6x128xf32> to vector<6x16xf32>
    %150 = vector.extract_strided_slice %13 {offsets = [0, 96], sizes = [6, 16], strides = [1, 1]} : vector<6x128xf32> to vector<6x16xf32>
    %151 = vector.extract_strided_slice %14 {offsets = [0, 96], sizes = [6, 16], strides = [1, 1]} : vector<6x128xf32> to vector<6x16xf32>
    %cst_44 = arith.constant dense<0.000000e+00> : vector<6x6xf32>
    %152 = tpu.matmul %149, %150, %cst_44 {dimension_numbers = #tpu.dot_dimension_numbers<[1], [1], [0], [0], [0, 0, 1, 0], [], []>} : vector<6x16xf32>, vector<6x16xf32>, vector<6x6xf32> -> vector<6x6xf32>
    %153 = arith.addf %152, %52 : vector<6x6xf32>
    %cst_45 = arith.constant dense<0xFF800000> : vector<6xf32>
    %154 = vector.multi_reduction <maximumf>, %153, %cst_45 [1] : vector<6x6xf32> to vector<6xf32>
    %155 = vector.shape_cast %154 : vector<6xf32> to vector<6x1xf32>
    %156 = vector.broadcast %155 : vector<6x1xf32> to vector<6x6xf32>
    %157 = arith.subf %153, %156 : vector<6x6xf32>
    %158 = math.exp %157 : vector<6x6xf32>
    %cst_46 = arith.constant dense<0.000000e+00> : vector<6xf32>
    %159 = vector.multi_reduction <add>, %158, %cst_46 [1] : vector<6x6xf32> to vector<6xf32>
    %160 = vector.shape_cast %159 : vector<6xf32> to vector<6x1xf32>
    %161 = tpu.reciprocal %160 : vector<6x1xf32> -> vector<6x1xf32>
    %162 = vector.broadcast %161 : vector<6x1xf32> to vector<6x6xf32>
    %163 = arith.mulf %158, %162 : vector<6x6xf32>
    %cst_47 = arith.constant dense<0.000000e+00> : vector<6x16xf32>
    %164 = tpu.matmul %163, %151, %cst_47 {dimension_numbers = #tpu.dot_dimension_numbers<[1], [0], [0], [1], [0, 0, 1, 1], [], []>} : vector<6x6xf32>, vector<6x16xf32>, vector<6x16xf32> -> vector<6x16xf32>
    %165 = vector.extract_strided_slice %12 {offsets = [0, 112], sizes = [6, 16], strides = [1, 1]} : vector<6x128xf32> to vector<6x16xf32>
    %166 = vector.extract_strided_slice %13 {offsets = [0, 112], sizes = [6, 16], strides = [1, 1]} : vector<6x128xf32> to vector<6x16xf32>
    %167 = vector.extract_strided_slice %14 {offsets = [0, 112], sizes = [6, 16], strides = [1, 1]} : vector<6x128xf32> to vector<6x16xf32>
    %cst_48 = arith.constant dense<0.000000e+00> : vector<6x6xf32>
    %168 = tpu.matmul %165, %166, %cst_48 {dimension_numbers = #tpu.dot_dimension_numbers<[1], [1], [0], [0], [0, 0, 1, 0], [], []>} : vector<6x16xf32>, vector<6x16xf32>, vector<6x6xf32> -> vector<6x6xf32>
    %169 = arith.addf %168, %52 : vector<6x6xf32>
    %cst_49 = arith.constant dense<0xFF800000> : vector<6xf32>
    %170 = vector.multi_reduction <maximumf>, %169, %cst_49 [1] : vector<6x6xf32> to vector<6xf32>
    %171 = vector.shape_cast %170 : vector<6xf32> to vector<6x1xf32>
    %172 = vector.broadcast %171 : vector<6x1xf32> to vector<6x6xf32>
    %173 = arith.subf %169, %172 : vector<6x6xf32>
    %174 = math.exp %173 : vector<6x6xf32>
    %cst_50 = arith.constant dense<0.000000e+00> : vector<6xf32>
    %175 = vector.multi_reduction <add>, %174, %cst_50 [1] : vector<6x6xf32> to vector<6xf32>
    %176 = vector.shape_cast %175 : vector<6xf32> to vector<6x1xf32>
    %177 = tpu.reciprocal %176 : vector<6x1xf32> -> vector<6x1xf32>
    %178 = vector.broadcast %177 : vector<6x1xf32> to vector<6x6xf32>
    %179 = arith.mulf %174, %178 : vector<6x6xf32>
    %cst_51 = arith.constant dense<0.000000e+00> : vector<6x16xf32>
    %180 = tpu.matmul %179, %167, %cst_51 {dimension_numbers = #tpu.dot_dimension_numbers<[1], [0], [0], [1], [0, 0, 1, 1], [], []>} : vector<6x6xf32>, vector<6x16xf32>, vector<6x16xf32> -> vector<6x16xf32>
    %181 = tpu.concatenate %68, %84, %100, %116, %132, %148, %164, %180 in 1 : vector<6x16xf32>, vector<6x16xf32>, vector<6x16xf32>, vector<6x16xf32>, vector<6x16xf32>, vector<6x16xf32>, vector<6x16xf32>, vector<6x16xf32> -> vector<6x128xf32>
    %182 = arith.truncf %181 : vector<6x128xf32> to vector<6x128xbf16>
    %c0_52 = arith.constant 0 : index
    %c0_53 = arith.constant 0 : index
    %c0_54 = arith.constant 0 : index
    %183 = vector.load %arg4[%c0_52, %c0_53, %c0_54] : memref<1x128x128xbf16, #tpu.memory_space<vmem>>, vector<1x128x128xbf16>
    %184 = vector.shape_cast %183 : vector<1x128x128xbf16> to vector<128x128xbf16>
    %cst_55 = arith.constant dense<0.000000e+00> : vector<6x128xf32>
    %185 = tpu.matmul %182, %184, %cst_55 {dimension_numbers = #tpu.dot_dimension_numbers<[1], [0], [0], [1], [0, 0, 1, 1], [], []>} : vector<6x128xbf16>, vector<128x128xbf16>, vector<6x128xf32> -> vector<6x128xf32>
    %c0_56 = arith.constant 0 : index
    %c0_57 = arith.constant 0 : index
    %c0_58 = arith.constant 0 : index
    %186 = vector.load %arg5[%c0_56, %c0_57, %c0_58] : memref<1x1x128xf32, #tpu.memory_space<vmem>>, vector<1x1x128xf32>
    %187 = vector.shape_cast %186 : vector<1x1x128xf32> to vector<1x128xf32>
    %188 = vector.broadcast %187 : vector<1x128xf32> to vector<6x128xf32>
    %189 = arith.addf %185, %188 : vector<6x128xf32>
    %190 = arith.addf %3, %189 : vector<6x128xf32>
    %c0_59 = arith.constant 0 : index
    %c0_60 = arith.constant 0 : index
    %c0_61 = arith.constant 0 : index
    %191 = vector.load %arg6[%c0_59, %c0_60, %c0_61] : memref<1x1x128xf32, #tpu.memory_space<vmem>>, vector<1x1x128xf32>
    %192 = vector.shape_cast %191 : vector<1x1x128xf32> to vector<1x128xf32>
    %c0_62 = arith.constant 0 : index
    %c0_63 = arith.constant 0 : index
    %c0_64 = arith.constant 0 : index
    %193 = vector.load %arg7[%c0_62, %c0_63, %c0_64] : memref<1x1x128xf32, #tpu.memory_space<vmem>>, vector<1x1x128xf32>
    %194 = vector.shape_cast %193 : vector<1x1x128xf32> to vector<1x128xf32>
    %cst_65 = arith.constant dense<0.000000e+00> : vector<6xf32>
    %195 = vector.multi_reduction <add>, %190, %cst_65 [1] : vector<6x128xf32> to vector<6xf32>
    %196 = vector.shape_cast %195 : vector<6xf32> to vector<6x1xf32>
    %cst_66 = arith.constant 1.280000e+02 : f32
    %197 = vector.broadcast %cst_66 : f32 to vector<6x1xf32>
    %198 = arith.divf %196, %197 : vector<6x1xf32>
    %199 = vector.broadcast %198 : vector<6x1xf32> to vector<6x128xf32>
    %200 = arith.subf %190, %199 : vector<6x128xf32>
    %201 = arith.mulf %200, %200 : vector<6x128xf32>
    %cst_67 = arith.constant dense<0.000000e+00> : vector<6xf32>
    %202 = vector.multi_reduction <add>, %201, %cst_67 [1] : vector<6x128xf32> to vector<6xf32>
    %203 = vector.shape_cast %202 : vector<6xf32> to vector<6x1xf32>
    %cst_68 = arith.constant 1.280000e+02 : f32
    %204 = vector.broadcast %cst_68 : f32 to vector<6x1xf32>
    %205 = arith.divf %203, %204 : vector<6x1xf32>
    %206 = vector.broadcast %198 : vector<6x1xf32> to vector<6x128xf32>
    %207 = arith.subf %190, %206 : vector<6x128xf32>
    %cst_69 = arith.constant 9.99999974E-6 : f32
    %208 = vector.broadcast %cst_69 : f32 to vector<6x1xf32>
    %209 = arith.addf %205, %208 : vector<6x1xf32>
    %210 = math.rsqrt %209 : vector<6x1xf32>
    %211 = vector.broadcast %210 : vector<6x1xf32> to vector<6x128xf32>
    %212 = arith.mulf %207, %211 : vector<6x128xf32>
    %213 = vector.broadcast %192 : vector<1x128xf32> to vector<6x128xf32>
    %214 = arith.mulf %212, %213 : vector<6x128xf32>
    %215 = vector.broadcast %194 : vector<1x128xf32> to vector<6x128xf32>
    %216 = arith.addf %214, %215 : vector<6x128xf32>
    %c1_i32_70 = arith.constant 1 : i32
    %217 = arith.cmpi ne, %arg0, %c1_i32_70 : i32
    %218 = arith.extui %217 : i1 to i32
    %c0_i32_71 = arith.constant 0 : i32
    %219 = arith.cmpi ne, %218, %c0_i32_71 : i32
    scf.if %219 {
      %223 = arith.truncf %216 : vector<6x128xf32> to vector<6x128xbf16>
      %c0_74 = arith.constant 0 : index
      %c0_75 = arith.constant 0 : index
      %c0_76 = arith.constant 0 : index
      %224 = vector.load %arg8[%c0_74, %c0_75, %c0_76] : memref<1x128x256xbf16, #tpu.memory_space<vmem>>, vector<1x128x256xbf16>
      %225 = vector.shape_cast %224 : vector<1x128x256xbf16> to vector<128x256xbf16>
      %cst_77 = arith.constant dense<0.000000e+00> : vector<6x256xf32>
      %226 = tpu.matmul %223, %225, %cst_77 {dimension_numbers = #tpu.dot_dimension_numbers<[1], [0], [0], [1], [0, 0, 1, 1], [], []>} : vector<6x128xbf16>, vector<128x256xbf16>, vector<6x256xf32> -> vector<6x256xf32>
      %c0_78 = arith.constant 0 : index
      %c0_79 = arith.constant 0 : index
      %c0_80 = arith.constant 0 : index
      %227 = vector.load %arg9[%c0_78, %c0_79, %c0_80] : memref<1x1x256xf32, #tpu.memory_space<vmem>>, vector<1x1x256xf32>
      %228 = vector.shape_cast %227 : vector<1x1x256xf32> to vector<1x256xf32>
      %229 = vector.broadcast %228 : vector<1x256xf32> to vector<6x256xf32>
      %230 = arith.addf %226, %229 : vector<6x256xf32>
      %cst_81 = arith.constant 0.000000e+00 : f32
      %231 = vector.broadcast %cst_81 : f32 to vector<6x256xf32>
      %232 = arith.maximumf %230, %231 : vector<6x256xf32>
      %233 = arith.truncf %232 : vector<6x256xf32> to vector<6x256xbf16>
      %c0_82 = arith.constant 0 : index
      %c0_83 = arith.constant 0 : index
      %c0_84 = arith.constant 0 : index
      %234 = vector.load %arg10[%c0_82, %c0_83, %c0_84] : memref<1x256x128xbf16, #tpu.memory_space<vmem>>, vector<1x256x128xbf16>
      %235 = vector.shape_cast %234 : vector<1x256x128xbf16> to vector<256x128xbf16>
      %cst_85 = arith.constant dense<0.000000e+00> : vector<6x128xf32>
      %236 = tpu.matmul %233, %235, %cst_85 {dimension_numbers = #tpu.dot_dimension_numbers<[1], [0], [0], [1], [0, 0, 1, 1], [], []>} : vector<6x256xbf16>, vector<256x128xbf16>, vector<6x128xf32> -> vector<6x128xf32>
      %c0_86 = arith.constant 0 : index
      %c0_87 = arith.constant 0 : index
      %c0_88 = arith.constant 0 : index
      %237 = vector.load %arg11[%c0_86, %c0_87, %c0_88] : memref<1x1x128xf32, #tpu.memory_space<vmem>>, vector<1x1x128xf32>
      %238 = vector.shape_cast %237 : vector<1x1x128xf32> to vector<1x128xf32>
      %239 = vector.broadcast %238 : vector<1x128xf32> to vector<6x128xf32>
      %240 = arith.addf %236, %239 : vector<6x128xf32>
      %241 = arith.addf %216, %240 : vector<6x128xf32>
      %c0_89 = arith.constant 0 : index
      %c0_90 = arith.constant 0 : index
      %c0_91 = arith.constant 0 : index
      %242 = vector.load %arg12[%c0_89, %c0_90, %c0_91] : memref<1x1x128xf32, #tpu.memory_space<vmem>>, vector<1x1x128xf32>
      %243 = vector.shape_cast %242 : vector<1x1x128xf32> to vector<1x128xf32>
      %c0_92 = arith.constant 0 : index
      %c0_93 = arith.constant 0 : index
      %c0_94 = arith.constant 0 : index
      %244 = vector.load %arg13[%c0_92, %c0_93, %c0_94] : memref<1x1x128xf32, #tpu.memory_space<vmem>>, vector<1x1x128xf32>
      %245 = vector.shape_cast %244 : vector<1x1x128xf32> to vector<1x128xf32>
      %cst_95 = arith.constant dense<0.000000e+00> : vector<6xf32>
      %246 = vector.multi_reduction <add>, %241, %cst_95 [1] : vector<6x128xf32> to vector<6xf32>
      %247 = vector.shape_cast %246 : vector<6xf32> to vector<6x1xf32>
      %cst_96 = arith.constant 1.280000e+02 : f32
      %248 = vector.broadcast %cst_96 : f32 to vector<6x1xf32>
      %249 = arith.divf %247, %248 : vector<6x1xf32>
      %250 = vector.broadcast %249 : vector<6x1xf32> to vector<6x128xf32>
      %251 = arith.subf %241, %250 : vector<6x128xf32>
      %252 = arith.mulf %251, %251 : vector<6x128xf32>
      %cst_97 = arith.constant dense<0.000000e+00> : vector<6xf32>
      %253 = vector.multi_reduction <add>, %252, %cst_97 [1] : vector<6x128xf32> to vector<6xf32>
      %254 = vector.shape_cast %253 : vector<6xf32> to vector<6x1xf32>
      %cst_98 = arith.constant 1.280000e+02 : f32
      %255 = vector.broadcast %cst_98 : f32 to vector<6x1xf32>
      %256 = arith.divf %254, %255 : vector<6x1xf32>
      %257 = vector.broadcast %249 : vector<6x1xf32> to vector<6x128xf32>
      %258 = arith.subf %241, %257 : vector<6x128xf32>
      %cst_99 = arith.constant 9.99999974E-6 : f32
      %259 = vector.broadcast %cst_99 : f32 to vector<6x1xf32>
      %260 = arith.addf %256, %259 : vector<6x1xf32>
      %261 = math.rsqrt %260 : vector<6x1xf32>
      %262 = vector.broadcast %261 : vector<6x1xf32> to vector<6x128xf32>
      %263 = arith.mulf %258, %262 : vector<6x128xf32>
      %264 = vector.broadcast %243 : vector<1x128xf32> to vector<6x128xf32>
      %265 = arith.mulf %263, %264 : vector<6x128xf32>
      %266 = vector.broadcast %245 : vector<1x128xf32> to vector<6x128xf32>
      %267 = arith.addf %265, %266 : vector<6x128xf32>
      %c0_100 = arith.constant 0 : index
      %c0_101 = arith.constant 0 : index
      %268 = vector.load %arg17[%c0_100, %c0_101] : memref<6x128xf32, #tpu.memory_space<vmem>>, vector<6x128xf32>
      tpu.vector_store %arg17[%c0_100, %c0_101], %267 {strides = array<i32>} : memref<6x128xf32, #tpu.memory_space<vmem>>, vector<6x128xf32>,
    } else {
    }
    %c1_i32_72 = arith.constant 1 : i32
    %220 = arith.cmpi eq, %arg0, %c1_i32_72 : i32
    %221 = arith.extui %220 : i1 to i32
    %c0_i32_73 = arith.constant 0 : i32
    %222 = arith.cmpi ne, %221, %c0_i32_73 : i32
    scf.if %222 {
      %223 = vector.extract_strided_slice %216 {offsets = [0, 0], sizes = [2, 128], strides = [1, 1]} : vector<6x128xf32> to vector<2x128xf32>
      %224 = arith.truncf %223 : vector<2x128xf32> to vector<2x128xbf16>
      %c0_74 = arith.constant 0 : index
      %c0_75 = arith.constant 0 : index
      %c0_76 = arith.constant 0 : index
      %225 = vector.load %arg8[%c0_74, %c0_75, %c0_76] : memref<1x128x256xbf16, #tpu.memory_space<vmem>>, vector<1x128x256xbf16>
      %226 = vector.shape_cast %225 : vector<1x128x256xbf16> to vector<128x256xbf16>
      %cst_77 = arith.constant dense<0.000000e+00> : vector<2x256xf32>
      %227 = tpu.matmul %224, %226, %cst_77 {dimension_numbers = #tpu.dot_dimension_numbers<[1], [0], [0], [1], [0, 0, 1, 1], [], []>} : vector<2x128xbf16>, vector<128x256xbf16>, vector<2x256xf32> -> vector<2x256xf32>
      %c0_78 = arith.constant 0 : index
      %c0_79 = arith.constant 0 : index
      %c0_80 = arith.constant 0 : index
      %228 = vector.load %arg9[%c0_78, %c0_79, %c0_80] : memref<1x1x256xf32, #tpu.memory_space<vmem>>, vector<1x1x256xf32>
      %229 = vector.shape_cast %228 : vector<1x1x256xf32> to vector<1x256xf32>
      %230 = vector.broadcast %229 : vector<1x256xf32> to vector<2x256xf32>
      %231 = arith.addf %227, %230 : vector<2x256xf32>
      %cst_81 = arith.constant 0.000000e+00 : f32
      %232 = vector.broadcast %cst_81 : f32 to vector<2x256xf32>
      %233 = arith.maximumf %231, %232 : vector<2x256xf32>
      %234 = arith.truncf %233 : vector<2x256xf32> to vector<2x256xbf16>
      %c0_82 = arith.constant 0 : index
      %c0_83 = arith.constant 0 : index
      %c0_84 = arith.constant 0 : index
      %235 = vector.load %arg10[%c0_82, %c0_83, %c0_84] : memref<1x256x128xbf16, #tpu.memory_space<vmem>>, vector<1x256x128xbf16>
      %236 = vector.shape_cast %235 : vector<1x256x128xbf16> to vector<256x128xbf16>
      %cst_85 = arith.constant dense<0.000000e+00> : vector<2x128xf32>
      %237 = tpu.matmul %234, %236, %cst_85 {dimension_numbers = #tpu.dot_dimension_numbers<[1], [0], [0], [1], [0, 0, 1, 1], [], []>} : vector<2x256xbf16>, vector<256x128xbf16>, vector<2x128xf32> -> vector<2x128xf32>
      %c0_86 = arith.constant 0 : index
      %c0_87 = arith.constant 0 : index
      %c0_88 = arith.constant 0 : index
      %238 = vector.load %arg11[%c0_86, %c0_87, %c0_88] : memref<1x1x128xf32, #tpu.memory_space<vmem>>, vector<1x1x128xf32>
      %239 = vector.shape_cast %238 : vector<1x1x128xf32> to vector<1x128xf32>
      %240 = vector.broadcast %239 : vector<1x128xf32> to vector<2x128xf32>
      %241 = arith.addf %237, %240 : vector<2x128xf32>
      %242 = arith.addf %223, %241 : vector<2x128xf32>
      %c0_89 = arith.constant 0 : index
      %c0_90 = arith.constant 0 : index
      %c0_91 = arith.constant 0 : index
      %243 = vector.load %arg12[%c0_89, %c0_90, %c0_91] : memref<1x1x128xf32, #tpu.memory_space<vmem>>, vector<1x1x128xf32>
      %244 = vector.shape_cast %243 : vector<1x1x128xf32> to vector<1x128xf32>
      %c0_92 = arith.constant 0 : index
      %c0_93 = arith.constant 0 : index
      %c0_94 = arith.constant 0 : index
      %245 = vector.load %arg13[%c0_92, %c0_93, %c0_94] : memref<1x1x128xf32, #tpu.memory_space<vmem>>, vector<1x1x128xf32>
      %246 = vector.shape_cast %245 : vector<1x1x128xf32> to vector<1x128xf32>
      %cst_95 = arith.constant dense<0.000000e+00> : vector<2xf32>
      %247 = vector.multi_reduction <add>, %242, %cst_95 [1] : vector<2x128xf32> to vector<2xf32>
      %248 = vector.shape_cast %247 : vector<2xf32> to vector<2x1xf32>
      %cst_96 = arith.constant 1.280000e+02 : f32
      %249 = vector.broadcast %cst_96 : f32 to vector<2x1xf32>
      %250 = arith.divf %248, %249 : vector<2x1xf32>
      %251 = vector.broadcast %250 : vector<2x1xf32> to vector<2x128xf32>
      %252 = arith.subf %242, %251 : vector<2x128xf32>
      %253 = arith.mulf %252, %252 : vector<2x128xf32>
      %cst_97 = arith.constant dense<0.000000e+00> : vector<2xf32>
      %254 = vector.multi_reduction <add>, %253, %cst_97 [1] : vector<2x128xf32> to vector<2xf32>
      %255 = vector.shape_cast %254 : vector<2xf32> to vector<2x1xf32>
      %cst_98 = arith.constant 1.280000e+02 : f32
      %256 = vector.broadcast %cst_98 : f32 to vector<2x1xf32>
      %257 = arith.divf %255, %256 : vector<2x1xf32>
      %258 = vector.broadcast %250 : vector<2x1xf32> to vector<2x128xf32>
      %259 = arith.subf %242, %258 : vector<2x128xf32>
      %cst_99 = arith.constant 9.99999974E-6 : f32
      %260 = vector.broadcast %cst_99 : f32 to vector<2x1xf32>
      %261 = arith.addf %257, %260 : vector<2x1xf32>
      %262 = math.rsqrt %261 : vector<2x1xf32>
      %263 = vector.broadcast %262 : vector<2x1xf32> to vector<2x128xf32>
      %264 = arith.mulf %259, %263 : vector<2x128xf32>
      %265 = vector.broadcast %244 : vector<1x128xf32> to vector<2x128xf32>
      %266 = arith.mulf %264, %265 : vector<2x128xf32>
      %267 = vector.broadcast %246 : vector<1x128xf32> to vector<2x128xf32>
      %268 = arith.addf %266, %267 : vector<2x128xf32>
      %269 = arith.truncf %268 : vector<2x128xf32> to vector<2x128xbf16>
      %c0_100 = arith.constant 0 : index
      %c0_101 = arith.constant 0 : index
      %270 = vector.load %arg14[%c0_100, %c0_101] : memref<128x128xbf16, #tpu.memory_space<vmem>>, vector<128x128xbf16>
      %cst_102 = arith.constant dense<0.000000e+00> : vector<2x128xf32>
      %271 = tpu.matmul %269, %270, %cst_102 {dimension_numbers = #tpu.dot_dimension_numbers<[1], [0], [0], [1], [0, 0, 1, 1], [], []>} : vector<2x128xbf16>, vector<128x128xbf16>, vector<2x128xf32> -> vector<2x128xf32>
      %c0_103 = arith.constant 0 : index
      %c0_104 = arith.constant 0 : index
      %272 = vector.load %arg15[%c0_103, %c0_104] : memref<1x128xf32, #tpu.memory_space<vmem>>, vector<1x128xf32>
      %273 = vector.broadcast %272 : vector<1x128xf32> to vector<2x128xf32>
      %274 = arith.addf %271, %273 : vector<2x128xf32>
      %275 = arith.negf %274 : vector<2x128xf32>
      %276 = math.exp %275 : vector<2x128xf32>
      %cst_105 = arith.constant 1.000000e+00 : f32
      %277 = vector.broadcast %cst_105 : f32 to vector<2x128xf32>
      %278 = arith.addf %277, %276 : vector<2x128xf32>
      %279 = arith.divf %277, %278 : vector<2x128xf32>
      %c0_106 = arith.constant 0 : index
      %c0_107 = arith.constant 0 : index
      %280 = vector.load %arg16[%c0_106, %c0_107] : memref<2x128xf32, #tpu.memory_space<vmem>>, vector<2x128xf32>
      tpu.vector_store %arg16[%c0_106, %c0_107], %279 {strides = array<i32>} : memref<2x128xf32, #tpu.memory_space<vmem>>, vector<2x128xf32>,
    } else {
    }
    return
  }
  func.func @transform_0(%arg0: i32) -> (i32, i32) {
    %c0_i32 = arith.constant 0 : i32
    %c0_i32_0 = arith.constant 0 : i32
    %c0_i32_1 = arith.constant 0 : i32
    return %c0_i32, %c0_i32_0 : i32, i32
  }
  func.func @transform_1(%arg0: i32) -> (i32, i32, i32) {
    %c0_i32 = arith.constant 0 : i32
    %c0_i32_0 = arith.constant 0 : i32
    %c0_i32_1 = arith.constant 0 : i32
    return %arg0, %c0_i32, %c0_i32_0 : i32, i32, i32
  }
  func.func @transform_2(%arg0: i32) -> (i32, i32, i32) {
    %c0_i32 = arith.constant 0 : i32
    %c0_i32_0 = arith.constant 0 : i32
    %c0_i32_1 = arith.constant 0 : i32
    return %arg0, %c0_i32, %c0_i32_0 : i32, i32, i32
  }
  func.func @transform_3(%arg0: i32) -> (i32, i32, i32) {
    %c0_i32 = arith.constant 0 : i32
    %c0_i32_0 = arith.constant 0 : i32
    %c0_i32_1 = arith.constant 0 : i32
    return %arg0, %c0_i32, %c0_i32_0 : i32, i32, i32
  }
  func.func @transform_4(%arg0: i32) -> (i32, i32, i32) {
    %c0_i32 = arith.constant 0 : i32
    %c0_i32_0 = arith.constant 0 : i32
    %c0_i32_1 = arith.constant 0 : i32
    return %arg0, %c0_i32, %c0_i32_0 : i32, i32, i32
  }
  func.func @transform_5(%arg0: i32) -> (i32, i32, i32) {
    %c0_i32 = arith.constant 0 : i32
    %c0_i32_0 = arith.constant 0 : i32
    %c0_i32_1 = arith.constant 0 : i32
    return %arg0, %c0_i32, %c0_i32_0 : i32, i32, i32
  }
  func.func @transform_6(%arg0: i32) -> (i32, i32, i32) {
    %c0_i32 = arith.constant 0 : i32
    %c0_i32_0 = arith.constant 0 : i32
    %c0_i32_1 = arith.constant 0 : i32
    return %arg0, %c0_i32, %c0_i32_0 : i32, i32, i32
  }
  func.func @transform_7(%arg0: i32) -> (i32, i32, i32) {
    %c0_i32 = arith.constant 0 : i32
    %c0_i32_0 = arith.constant 0 : i32
    %c0_i32_1 = arith.constant 0 : i32
    return %arg0, %c0_i32, %c0_i32_0 : i32, i32, i32
  }
  func.func @transform_8(%arg0: i32) -> (i32, i32, i32) {
    %c0_i32 = arith.constant 0 : i32
    %c0_i32_0 = arith.constant 0 : i32
    %c0_i32_1 = arith.constant 0 : i32
    return %arg0, %c0_i32, %c0_i32_0 : i32, i32, i32
  }
  func.func @transform_9(%arg0: i32) -> (i32, i32, i32) {
    %c0_i32 = arith.constant 0 : i32
    %c0_i32_0 = arith.constant 0 : i32
    %c0_i32_1 = arith.constant 0 : i32
    return %arg0, %c0_i32, %c0_i32_0 : i32, i32, i32
  }
  func.func @transform_10(%arg0: i32) -> (i32, i32, i32) {
    %c0_i32 = arith.constant 0 : i32
    %c0_i32_0 = arith.constant 0 : i32
    %c0_i32_1 = arith.constant 0 : i32
    return %arg0, %c0_i32, %c0_i32_0 : i32, i32, i32
  }
  func.func @transform_11(%arg0: i32) -> (i32, i32, i32) {
    %c0_i32 = arith.constant 0 : i32
    %c0_i32_0 = arith.constant 0 : i32
    %c0_i32_1 = arith.constant 0 : i32
    return %arg0, %c0_i32, %c0_i32_0 : i32, i32, i32
  }
  func.func @transform_12(%arg0: i32) -> (i32, i32, i32) {
    %c0_i32 = arith.constant 0 : i32
    %c0_i32_0 = arith.constant 0 : i32
    %c0_i32_1 = arith.constant 0 : i32
    return %arg0, %c0_i32, %c0_i32_0 : i32, i32, i32
  }
  func.func @transform_13(%arg0: i32) -> (i32, i32) {
    %c0_i32 = arith.constant 0 : i32
    %c0_i32_0 = arith.constant 0 : i32
    %c0_i32_1 = arith.constant 0 : i32
    return %c0_i32, %c0_i32_0 : i32, i32
  }
  func.func @transform_14(%arg0: i32) -> (i32, i32) {
    %c0_i32 = arith.constant 0 : i32
    %c0_i32_0 = arith.constant 0 : i32
    %c0_i32_1 = arith.constant 0 : i32
    return %c0_i32, %c0_i32_0 : i32, i32
  }
  func.func @transform_15(%arg0: i32) -> (i32, i32) {
    %c0_i32 = arith.constant 0 : i32
    %c0_i32_0 = arith.constant 0 : i32
    %c0_i32_1 = arith.constant 0 : i32
    return %c0_i32, %c0_i32_0 : i32, i32
  }
}

</mosaic_0001>

<bundles_post_ra>
// kernel: prompt_learner_forward.2
= control target key start
LH: loop header
LB: loop body
LE: loop exit
PB: predicated region body
PF: predicated region fallthrough
CT: control target
= control target key end

     0   :  { %10 = vsyncpa [#allocation4], 0  ;;  %s1352_s0 = inlined_call_operand.vmem [shape: f32[2,768], index: 0, kind: input, shape index: {}]   ;;  %s1353_s1 = inlined_call_operand.hbm [shape: bf16[768,128], index: 1, kind: input, shape index: {}]   ;;  %s1354_s2 = inlined_call_operand.hbm [shape: f32[1,128], index: 2, kind: input, shape index: {}]   ;;  %s1355_s3 = inlined_call_operand.vmem [shape: f32[2,128], index: 3, kind: input, shape index: {}]   ;;  %s1356_s4 = inlined_call_operand.vmem [shape: f32[1,128], index: 4, kind: input, shape index: {}]   ;;  %s1357_s5 = inlined_call_operand.vmem [shape: f32[6,128], index: 5, kind: output, shape index: {}]  }
   0x1   :  { %12 = vsyncpa [#allocation4 + $0x1], 0 }
   0x2   :  { %13 = vsyncpa [#allocation6], 0  ;;  %s1137_s18 = smov 0   ;;  %s1139_s19 = smov 0  }
   0x3   :  { %s1141_s20 = smov 0   ;;  %s1143_s21 = smov 0  }
   0x4   :  { %s1145_s22 = smov 0   ;;  %s1147_s23 = smov 0  }
   0x5 LB: > { %s793_s24 = sadd.s32 4294967295, %s1097_s23   ;;  %s66_s25 = sadd.s32 1, %s1085_s20  ;;  %s1097_s23 = sphi %s1147_s23, %s19_s23   ;;  %s1093_s22 = sphi %s1145_s22, %s1377_s22   ;;  %s1089_s21 = sphi %s1143_s21, %s1376_s21   ;;  %s1085_s20 = sphi %s1141_s20, %s1375_s20   ;;  %s1081_s19 = sphi %s1139_s19, %s1374_s19   ;;  %s1077_s18 = sphi %s1137_s18, %s1373_s18  }
   0x6   : > { %p73_p0 = scmp.ne.s32.totalorder %s1085_s20, %s1081_s19  ;;  %p74_p1 = scmp.eq.s32.totalorder %s1097_s23, 0 }
   0x7   : > { %p79_p2 = scmp.ne.s32.totalorder %s1081_s19, %s1077_s18  ;;  %p1171_p3 = scmp.eq.s32.totalorder %s793_s24, 0 }
   0x8   : > { %p75_p4 = por %p74_p1, %p73_p0  ;;  %p794_p5 = scmp.ge.s32.totalorder %s1097_s23, 1 }
   0x9   : > { %s1363_s26 = scalar_select %p1171_p3, 1, 0 }
   0xa   : > { %p1178_p6 = por %p1171_p3, %p79_p2  ;;  %p194_p7 = scmp.lt.s32.totalorder %s1097_s23, 3 }
   0xb   : > { %s1099_s29 = smov [#allocation5]   ;;  %p903_p10 = scmp.lt.s32.totalorder %s1097_s23, 2 }
   0xc   : > { %s1364_s27 = scalar_select %p1178_p6, 1, 0 }
   0xd   : > { %p1183_p8 = pnand %p794_p5, %p194_p7  ;;  %s209_s30 = sshll.u32 %s1099_s29, 4  ;;  %s210_s30 = int_to_ptr.vmem [resolvable:$true] %s209_s30 }
   0xe   : > { %s242_s6 = sand.u32 1, %s1085_s20   ;;  %p1197_p12 = pnand %p903_p10, %p75_p4 }
   0xf   : > { %s1365_s28 = scalar_select %p1183_p8, 1, 0 }
  0x10   : > { %p894_p9 = pneg %p1183_p8  ;;  %s985_s11 = scalar_lea.hbm %s1354_s2, 16 }
  0x11   : > { %s1367_s8 = scalar_select %p1197_p12, 1, 0 }
  0x12   : > { %p1193_p11 = pnand %p894_p9, %p1171_p3  ;;  %p986_p13 = scmp.ne.s32.totalorder %s1354_s2, %s985_s11 }
  0x13   : > { %p992_p5 = scmp.lt.u32.totalorder %s985_s11, %s1354_s2 }
  0x14   : > { %p987_p0 = pneg %p1193_p11 }
  0x16   : > { %p988_p1 = pnand %p987_p0, %p986_p13 }
  0x18   : > { %p989_p2 = pneg %p988_p1 }
  0x1a   : > { %p994_p4 = pnand %p992_p5, %p989_p2 }
  0x1c   : > { %997 = shalt.err (!%p994_p4)
}
  0x1d   : > { %s998_s16 = scalar_lea.vmem %s210_s30, 16  ;;  %s1005_s17 = scalar_lea.vmem %s210_s30, 32 }
  0x1e   : > { %p999_p7 = scmp.ne.s32.totalorder %s210_s30, %s998_s16  ;;  %p1006_p3 = scmp.lt.s32.totalorder %s210_s30, %s210_s30 }
  0x1f   : > { %p1007_p6 = scmp.lt.s32.totalorder %s1005_s17, %s998_s16 }
  0x20   : > { %p1001_p9 = pnand %p999_p7, %p987_p0 }
  0x21   : > { %p1008_p8 = por %p1007_p6, %p1006_p3 }
  0x22   : > { %p1002_p10 = pneg %p1001_p9 }
  0x24   : > { %p1009_p12 = pnand %p1008_p8, %p1002_p10 }
  0x26   : > { %1012 = shalt.err (!%p1009_p12)
}
  0x27   : > { %897 = dma.hbm_to_vmem [thread:$0]  (!%p1193_p11), %s1354_s2, 16, %s210_s30, [#allocation6]  }
  0x28   : > { %s28_s29 = sadd.s32 1, %s1093_s22  ;;  %s886_s9 = smul.u32 192, %s242_s6 }
  0x29   : > { %p29_p13 = scmp.ge.s32.totalorder %s28_s29, 2  ;;  %s834_s10 = smul.u32 3072, %s1093_s22 }
  0x2a   : > { %s246_s13 = scalar_lea.vmem [#allocation3], %s886_s9  ;;  %s1238_s16 = scalar_lea.sflag [#allocation4], %s242_s6 }
  0x2b   : > { %s1379_s29 = smov (%p29_p13, %s28_s29), 0  ;;  %s1226_s12 = scalar_lea.hbm %s1353_s1, %s834_s10 }
  0x2c   : > { %s254_s30 = sshll.u32 %s246_s13, 4  ;;  %s61_s14 = ssub.s32 %s1093_s22, %s1379_s29  ;;  %s1230_s30 = int_to_ptr.vmem [resolvable:$true] %s254_s30 }
  0x2d   : > { %p1232_p3 = scmp.eq.s32.totalorder %s61_s14, 0  ;;  %s1013_s17 = scalar_lea.hbm %s1226_s12, 3072 }
  0x2e   : > { %p1014_p6 = scmp.ne.s32.totalorder %s1226_s12, %s1013_s17  ;;  %p1369_p8 = scmp.ne.s32.totalorder %s1367_s8, 0 }
  0x2f   : > { %s1018_s9 = scalar_lea.hbm %s1353_s1, 6144  ;;  %p1019_p1 = scmp.lt.u32.totalorder %s1226_s12, %s1353_s1 }
  0x30   : > { %p1015_p11 = pneg %p1369_p8  ;;  %p1020_p2 = scmp.lt.u32.totalorder %s1018_s9, %s1013_s17 }
  0x31   : > { %p1022_p4 = scmp.lt.u32.totalorder %s1013_s17, %s1226_s12 }
  0x32   : > { %p1016_p12 = pnand %p1015_p11, %p1014_p6  ;;  %p1021_p5 = por %p1020_p2, %p1019_p1 }
  0x34   : > { %p1017_p0 = pneg %p1016_p12  ;;  %p1023_p7 = por %p1022_p4, %p1021_p5 }
  0x36   : > { %p1024_p9 = pnand %p1023_p7, %p1017_p0 }
  0x38   : > { %1027 = shalt.err (!%p1024_p9)
}
  0x39   : > { %s1028_s6 = scalar_lea.vmem %s1230_s30, 3072  ;;  %s1100_s7 = smov [#allocation3]  }
  0x3a   : > { %p1029_p10 = scmp.ne.s32.totalorder %s1230_s30, %s1028_s6  ;;  %s1033_s13 = sshll.u32 %s1100_s7, 4  ;;  %s1034_s13 = int_to_ptr.vmem [resolvable:$false] %s1033_s13 }
  0x3b   : > { %s1035_s14 = scalar_lea.vmem %s1034_s13, 6144  ;;  %p1036_p12 = scmp.lt.s32.totalorder %s1230_s30, %s1034_s13 }
  0x3c   : > { %p1031_p13 = pnand %p1029_p10, %p1015_p11  ;;  %p1037_p1 = scmp.lt.s32.totalorder %s1035_s14, %s1028_s6 }
  0x3e   : > { %p1032_p6 = pneg %p1031_p13  ;;  %p1038_p2 = por %p1037_p1, %p1036_p12 }
  0x40   : > { %p1039_p5 = pnand %p1038_p2, %p1032_p6 }
  0x42   : > { %1042 = shalt.err (!%p1039_p5)
}
  0x43   : > { %s1101_s17 = smov 64   ;;  %s1102_s18 = smov 4  }
  0x44   : > { %901 = dma.hbm_to_vmem [thread:$0]  (!%p1369_p8), %s1226_s12, 3072, %s1230_s30, %s1238_s16, %s1101_s17, %s1101_s17, %s1102_s18  }
  0x45   : > { %s1271_s24 = scalar_select %p1232_p3, %s1085_s20, %s66_s25  }
  0x46   : > { %p1370_p11 = scmp.ne.s32.totalorder %s1365_s28, 0 }
  0x47   : > { %s268_s9 = sand.u32 (!%p1370_p11), 1, %s1081_s19   ;;  %p1371_p0 = scmp.ne.s32.totalorder (!%p1370_p11), %s1364_s27, 0 }
  0x48   : > { %266 = sbr.rel (%p1370_p11) target bundleno = 355 (0x163), region = 40  ;;  %s269_s11 = scalar_lea.sflag (!%p1370_p11), [#allocation4], %s268_s9 }
  0x49   : > { %s887_s10 = smul.u32 (!%p1370_p11), 192, %s268_s9 }
  0x4b   : > { %s1276_s6 = scalar_lea.vmem (!%p1370_p11), [#allocation3], %s887_s10 }
  0x4f   : > { %1068 = dma.done.wait (%p1371_p0), %s269_s11, 3072  }
  0x50   : > { %1070 = vsyncadd (%p1371_p0), %s269_s11, 4294964224  ;;  %p1372_p8 = scmp.ne.s32.totalorder %s1363_s26, 0 }
  0x52   : > { %1072 = dma.done.wait (%p1372_p8), [#allocation6], 16  }
  0x53   : > { %1074 = vsyncadd (%p1372_p8), [#allocation6], 4294967280  ;;  %s314_s25 = smul.u32 3, %s1089_s21  ;;  %p803_p4 = scmp.ne.s32.totalorder %s1089_s21, 0 }
  0x54   : > { %v1103_v0 = vmov (!%p803_p4), 0.0  }
  0x55   : > { %p315_p3 = scmp.lt.s32.totalorder %s314_s25, 5  ;;  %336 = sbr.rel (%p803_p4) target bundleno = 92 (0x5c), region = 52  ;;  %337 = vst [vmem:[#allocation2] sm:$0x3] (!%p803_p4), %v1103_v0 }
  0x57   : > { %s1381_s25 = smov (!%p315_p3, %s314_s25), 5 }
  0x58   : > { %s802_s28 = sshll.u32 %s1381_s25, 1 }
  0x59   : > { %s1290_s30 = scalar_lea.vmem %s1352_s0, %s802_s28 }
  0x5c PF: > { %v960_v1 = vld [vmem:[%s1276_s6 + $0x40] sm:$0xff]   ;;  %v1104_v2 = vmov 0.0   ;;  %vm1105_vm0 = vmmov 0   ;;  %v963_v5 = vld [vmem:[%s1276_s6 + $0x48] sm:$0xff]   ;;  %v966_v8 = vld [vmem:[%s1276_s6 + $0x50] sm:$0xff]   ;;  %v345_v21 = vlaneseq  ;;  %p828_p7 = scmp.ne.s32.totalorder %s1089_s21, 1 }
  0x5d   : > { %866 = vmatprep.subr.bf16.mxu1 %v1104_v2  ;;  %v961_v3 = vld [vmem:[%s1276_s6] sm:$0xff]   ;;  %835 = vmatprep.subr.bf16.mxu0 %v960_v1  ;;  %v964_v6 = vld [vmem:[%s1276_s6 + $0x8] sm:$0xff]   ;;  %v967_v9 = vld [vmem:[%s1276_s6 + $0x10] sm:$0xff]   ;;  %v1106_v26 = vmov 1983009808  }
  0x5e   : > { %v962_v4 = vld [vmem:[%s1276_s6 + $0x80] sm:$0xff]   ;;  %882 = vmatprep.mubr.msk.bf16.mxu1 %vm1105_vm0, %v1104_v2  ;;  %836 = vmatpush3.bf16.msra.mxu0 %v961_v3  ;;  %v965_v7 = vld [vmem:[%s1276_s6 + $0x88] sm:$0xff]   ;;  %v968_v10 = vld [vmem:[%s1276_s6 + $0x90] sm:$0xff]   ;;  %v343_v27 = vunpack.c.l.s4 %v1106_v26  ;;  %v346_v28 = vshrl.u32 %v345_v21, 7 }
  0x5f   : > { %867 = vmatpush3.bf16.msra.mxu1 %v962_v4  ;;  %837 = vmatprep.subr.bf16.mxu0 %v963_v5  ;;  %v969_v11 = vld [vmem:[%s1276_s6 + $0x58] sm:$0xff]   ;;  %v972_v14 = vld [vmem:[%s1276_s6 + $0x60] sm:$0xff]   ;;  %v975_v17 = vld [vmem:[%s1276_s6 + $0x68] sm:$0xff]  }
  0x60   : > { %868 = vmatprep.subr.bf16.mxu1 %v1104_v2  ;;  %v970_v12 = vld [vmem:[%s1276_s6 + $0x18] sm:$0xff]   ;;  %v973_v15 = vld [vmem:[%s1276_s6 + $0x20] sm:$0xff]   ;;  %v976_v18 = vld [vmem:[%s1276_s6 + $0x28] sm:$0xff]   ;;  %v344_v31 = vunpack.c.0.s8 %v343_v27  ;;  %v662_v57 = vsub.s32 (!%p828_p7), 0, %v346_v28  ;;  %v667_v58 = vsub.s32 (!%p828_p7), 1, %v346_v28 }
  0x61   : > { %v971_v13 = vld [vmem:[%s1276_s6 + $0x98] sm:$0xff]   ;;  %v974_v16 = vld [vmem:[%s1276_s6 + $0xa0] sm:$0xff]   ;;  %v977_v19 = vld [vmem:[%s1276_s6 + $0xa8] sm:$0xff]  }
  0x62   : > { %838 = vmatpush3.bf16.msra.mxu0 %v964_v6  ;;  %v978_v20 = vld [vmem:[%s1276_s6 + $0x70] sm:$0xff]   ;;  %v981_v24 = vld [vmem:[%s1276_s6 + $0x78] sm:$0xff]   ;;  %v347_v33 = vsub.s32 %v344_v31, %v346_v28  ;;  %v829_v53 = vld [vmem:[#allocation5] ss:$0 sm:$0xff] (!%p828_p7) }
  0x63   : > { %869 = vmatpush3.bf16.msra.mxu1 %v965_v7  ;;  %839 = vmatprep.subr.bf16.mxu0 %v966_v8  ;;  %v979_v22 = vld [vmem:[%s1276_s6 + $0x30] sm:$0xff]   ;;  %v339_v25 = vld [vmem:[%s1290_s30] sm:$0x3f] }
  0x64   : > { %870 = vmatprep.subr.bf16.mxu1 %v1104_v2  ;;  %v980_v23 = vld [vmem:[%s1276_s6 + $0xb0] sm:$0xff]   ;;  %v982_v29 = vld [vmem:[%s1276_s6 + $0x38] sm:$0xff]   ;;  %v341_v30 = vcombine.high %v339_v25, %v339_v25  ;;  %v348_v34 = vrot.slane %v339_v25, %v347_v33 }
  0x65   : > { %v983_v32 = vld [vmem:[%s1276_s6 + $0xb8] sm:$0xff]  }
  0x66   : > { %840 = vmatpush3.bf16.msra.mxu0 %v967_v9  ;;  %v355_v35 = vrot.slane %v341_v30, %v347_v33  ;;  %v356_v36 = vcombine.high %v348_v34, %v348_v34  ;;  %v360_v38 = vpack.c.bf16 %v348_v34, %v348_v34  ;;  %v338_v48 = vld [vmem:[#allocation2] sm:$0x3] }
  0x67   : > { %871 = vmatpush3.bf16.msra.mxu1 %v968_v10  ;;  %841 = vmatprep.subr.bf16.mxu0 %v969_v11  ;;  %v650_v54 = vld [vmem:[%s1355_s3] sm:$0x3] (!%p828_p7) }
  0x68   : > { %872 = vmatprep.subr.bf16.mxu1 %v1104_v2  ;;  %v362_v37 = vpack.c.bf16 %v355_v35, %v355_v35  ;;  %v361_v39 = vpack.c.bf16 %v356_v36, %v356_v36  ;;  %v830_v56 = vld [vmem:[%s1356_s4] ss:$0 sm:$0xff] (!%p828_p7) }
  0x69   : > { %v658_v59 = vadd.f32 (!%p828_p7), %v830_v56, %v650_v54 }
  0x6a   : > { %842 = vmatpush3.bf16.msra.mxu0 %v970_v12  ;;  %587 = vmatprep.mubr.bf16.mxu0 %v361_v39 }
  0x6b   : > { %873 = vmatpush3.bf16.msra.mxu1 %v971_v13  ;;  %843 = vmatprep.subr.bf16.mxu0 %v972_v14  ;;  %v663_v60 = vrot.slane (!%p828_p7), %v658_v59, %v662_v57  ;;  %v668_v61 = vrot.slane (!%p828_p7), %v658_v59, %v667_v58 }
  0x6c   : > { %874 = vmatprep.subr.bf16.mxu1 %v1104_v2 }
  0x6d   : > { %664 = vst [vmem:[%s1357_s5 + $0x2] sm:$0x3] (!%p828_p7), %v663_v60  ;;  %669 = vst [vmem:[%s1357_s5 + $0x4] sm:$0x3] (!%p828_p7), %v668_v61 }
  0x6e   : > { %844 = vmatpush3.bf16.msra.mxu0 %v973_v15 }
  0x6f   : > { %875 = vmatpush3.bf16.msra.mxu1 %v974_v16  ;;  %845 = vmatprep.subr.bf16.mxu0 %v975_v17 }
  0x70   : > { %876 = vmatprep.subr.bf16.mxu1 %v1104_v2 }
  0x72   : > { %846 = vmatpush3.bf16.msra.mxu0 %v976_v18 }
  0x73   : > { %877 = vmatpush3.bf16.msra.mxu1 %v977_v19  ;;  %847 = vmatprep.subr.bf16.mxu0 %v978_v20 }
  0x74   : > { %878 = vmatprep.subr.bf16.mxu1 %v1104_v2 }
  0x76   : > { %848 = vmatpush3.bf16.msra.mxu0 %v979_v22 }
  0x77   : > { %879 = vmatpush3.bf16.msra.mxu1 %v980_v23  ;;  %849 = vmatprep.subr.bf16.mxu0 %v981_v24 }
  0x78   : > { %880 = vmatprep.subr.bf16.mxu1 %v1104_v2 }
  0x7a   : > { %850 = vmatpush3.bf16.msra.mxu0 %v982_v29 }
  0x7b   : > { %881 = vmatpush3.bf16.msra.mxu1 %v983_v32 }
  0x7d   : > { %588 = vmatmul.mubr.bf16.vlgmr.msra.gmra.mrb[0].mxu0 %v360_v38 }
  0x7e   : > { %883 = vmatmul.mubr.bf16.vlgmr.msra.gmra.mrb[0].mxu1 %v362_v37 }
 0x150   : > { %v851_v43 = vpop.f32.mrb[0].mxu0 }
 0x151   : > { %v629_v40 = vpop.f32.mrb[0].mxu1  ;;  %v852_v45 = vpop.f32.mrb[1].mxu0 }
 0x152   : > { %v884_v41 = vpop.f32.mrb[1].mxu1  ;;  %v853_v46 = vadd.f32 %v852_v45, %v851_v43  ;;  %v854_v47 = vpop.f32.mrb[2].mxu0  ;;  %640 = sbr.rel (%p828_p7) target bundleno = 355 (0x163), region = 56 }
 0x153   : > { %v632_v42 = vpop.f32.mrb[2].mxu1  ;;  %v855_v49 = vpop.f32.mrb[3].mxu0 }
 0x154   : > { %v885_v44 = vpop.f32.mrb[3].mxu1  ;;  %v630_v50 = vadd.f32 %v853_v46, %v629_v40 }
 0x156   : > { %v635_v51 = vadd.f32 %v630_v50, %v338_v48 }
 0x158   : > { %636 = vst [vmem:[#allocation2] sm:$0x3] %v635_v51 }
 0x15f   : > { %v641_v52 = vld [vmem:[#allocation2] sm:$0x3] }
 0x160   : > { %v649_v55 = vadd.f32 %v829_v53, %v641_v52 }
 0x162   : > { %659 = vst [vmem:[%s1357_s5] sm:$0x3] %v649_v55 }
 0x163 PF: > { %s19_s23 = sadd.s32 1, %s1097_s23   ;;  %s1373_s18 = smov %s1081_s19 }
 0x164   : > { %p16_p9 = scmp.ge.s32.totalorder %s19_s23, 4   ;;  %s1374_s19 = smov %s1085_s20 }
 0x165   : > { %s1375_s20 = smov %s1271_s24  ;;  %s1376_s21 = smov %s1093_s22 }
 0x166   : > { %s1377_s22 = smov %s1379_s29  ;;  %18 = sbr.rel (!%p16_p9) target bundleno = 5 (0x5), region = 102 }
 0x16d   :  { %689 = vsyncpa [#allocation4], 1 }
 0x16e   :  { %691 = vsyncpa [#allocation4 + $0x1], 1 }
 0x16f   :  { %692 = vsyncpa [#allocation6], 1 }

// kernel: prompt_learner_forward.3
= control target key start
LH: loop header
LB: loop body
LE: loop exit
PB: predicated region body
PF: predicated region fallthrough
CT: control target
= control target key end

     0   :  { %s5161_s0 = inlined_call_operand.vmem [shape: f32[6,128], index: 0, kind: input, shape index: {}]   ;;  %s5162_s1 = inlined_call_operand.vmem [shape: bf16[2,128,384], index: 1, kind: input, shape index: {}]   ;;  %s5163_s2 = inlined_call_operand.vmem [shape: f32[2,1,384], index: 2, kind: input, shape index: {}]   ;;  %s5164_s3 = inlined_call_operand.vmem [shape: bf16[2,128,128], index: 3, kind: input, shape index: {}]   ;;  %s5165_s4 = inlined_call_operand.vmem [shape: f32[2,1,128], index: 4, kind: input, shape index: {}]   ;;  %s5166_s5 = inlined_call_operand.vmem [shape: f32[2,1,128], index: 5, kind: input, shape index: {}]   ;;  %s5167_s6 = inlined_call_operand.vmem [shape: f32[2,1,128], index: 6, kind: input, shape index: {}]   ;;  %s5168_s7 = inlined_call_operand.hbm [shape: bf16[2,128,256], index: 7, kind: input, shape index: {}]   ;;  %s5169_s8 = inlined_call_operand.vmem [shape: f32[2,1,256], index: 8, kind: input, shape index: {}]   ;;  %s5170_s9 = inlined_call_operand.hbm [shape: bf16[2,256,128], index: 9, kind: input, shape index: {}]   ;;  %s5171_s10 = inlined_call_operand.vmem [shape: f32[2,1,128], index: 10, kind: input, shape index: {}]   ;;  %s5172_s11 = inlined_call_operand.vmem [shape: f32[2,1,128], index: 11, kind: input, shape index: {}]   ;;  %s5173_s12 = inlined_call_operand.vmem [shape: f32[2,1,128], index: 12, kind: input, shape index: {}]   ;;  %s5174_s13 = inlined_call_operand.hbm [shape: bf16[128,128], index: 13, kind: input, shape index: {}]   ;;  %s5175_s14 = inlined_call_operand.hbm [shape: f32[1,128], index: 14, kind: input, shape index: {}]   ;;  %s5176_s15 = inlined_call_operand.vmem [shape: f32[2,128], index: 15, kind: output, shape index: {}]  }
   0x1   :  { %5183 = sst [smem:[#allocation15_spill]] %s5161_s0 }
   0x2   :  { %5184 = sst [smem:[#allocation16_spill]] %s5162_s1 }
   0x3   :  { %5185 = sst [smem:[#allocation17_spill]] %s5163_s2 }
   0x4   :  { %5186 = sst [smem:[#allocation18_spill]] %s5164_s3 }
   0x5   :  { %5187 = sst [smem:[#allocation19_spill]] %s5168_s7 }
   0x6   :  { %5188 = sst [smem:[#allocation20_spill]] %s5170_s9 }
   0x7   :  { %5189 = sst [smem:[#allocation21_spill]] %s5171_s10 }
   0x8   :  { %5190 = sst [smem:[#allocation22_spill]] %s5172_s11 }
   0x9   :  { %5191 = sst [smem:[#allocation23_spill]] %s5173_s12 }
   0xa   :  { %5192 = sst [smem:[#allocation24_spill]] %s5174_s13 }
   0xb   :  { %5193 = sst [smem:[#allocation25_spill]] %s5175_s14 }
   0xc   :  { %5194 = sst [smem:[#allocation26_spill]] %s5176_s15 }
   0xd   :  { %20 = vsyncpa [#allocation4], 0 }
   0xe   :  { %22 = vsyncpa [#allocation4 + $0x1], 0 }
   0xf   :  { %23 = vsyncpa [#allocation6], 0 }
  0x10   :  { %25 = vsyncpa [#allocation6 + $0x1], 0 }
  0x11   :  { %26 = vsyncpa [#allocation9], 0  ;;  %s4506_s18 = smov 0   ;;  %s4508_s19 = smov 0  }
  0x12   :  { %s4510_s20 = smov 0   ;;  %s4512_s21 = smov 0  }
  0x13 LB: > { %s4525_s22 = sadd.s32 4294967295, %s4401_s21   ;;  %p229_p0 = scmp.ne.s32.totalorder %s4393_s19, %s4389_s18  ;;  %s4401_s21 = sphi %s4512_s21, %s5228_s21   ;;  %s4397_s20 = sphi %s4510_s20, %s5227_s20   ;;  %s4393_s19 = sphi %s4508_s19, %s5226_s19   ;;  %s4389_s18 = sphi %s4506_s18, %s5225_s18  }
  0x14   : > { %p5177_p1 = scmp.eq.s32.totalorder %s4525_s22, 0  ;;  %p3566_p2 = scmp.ge.s32.totalorder %s4401_s21, 1 }
  0x15   : > { %p433_p3 = scmp.lt.s32.totalorder %s4401_s21, 3  ;;  %s4403_s25 = smov [#allocation7]  }
  0x16   : > { %p4534_p5 = por %p5177_p1, %p229_p0  ;;  %s448_s26 = sshll.u32 %s4403_s25, 4  ;;  %s449_s26 = int_to_ptr.vmem [resolvable:$true] %s448_s26 }
  0x17   : > { %p4538_p6 = pnand %p3566_p2, %p433_p3  ;;  %s4404_s28 = smov [#allocation8]  }
  0x18   : > { %s5195_s23 = scalar_select %p4534_p5, 1, 0 }
  0x19   : > { %s5196_s24 = scalar_select %p4538_p6, 1, 0 }
  0x1a   : > { %p3997_p7 = pneg %p4538_p6  ;;  %s462_s29 = sshll.u32 %s4404_s28, 4  ;;  %s4550_s29 = int_to_ptr.vmem [resolvable:$true] %s462_s29 }
  0x1b   : > { %s5198_s13 = sld [smem:[#allocation24_spill]] }
  0x1c   : > { %p4546_p8 = pnand %p3997_p7, %p5177_p1 }
  0x1e   : > { %p4241_p10 = pneg %p4546_p8 }
  0x21   : > { %s4239_s17 = scalar_lea.hbm %s5198_s13, 1024 }
  0x22   : > { %p4240_p9 = scmp.ne.s32.totalorder %s5198_s13, %s4239_s17  ;;  %p4246_p13 = scmp.lt.u32.totalorder %s4239_s17, %s5198_s13 }
  0x24   : > { %p4242_p11 = pnand %p4241_p10, %p4240_p9 }
  0x26   : > { %p4243_p12 = pneg %p4242_p11 }
  0x28   : > { %p4248_p0 = pnand %p4246_p13, %p4243_p12 }
  0x2a   : > { %4251 = shalt.err (!%p4248_p0)
}
  0x2b   : > { %s4252_s28 = scalar_lea.vmem %s449_s26, 1024  ;;  %p4260_p4 = scmp.lt.s32.totalorder %s449_s26, %s449_s26 }
  0x2c   : > { %p4253_p2 = scmp.ne.s32.totalorder %s449_s26, %s4252_s28  ;;  %p4261_p1 = scmp.lt.s32.totalorder %s4252_s28, %s4252_s28 }
  0x2e   : > { %p4255_p3 = pnand %p4253_p2, %p4241_p10  ;;  %p4262_p5 = por %p4261_p1, %p4260_p4 }
  0x30   : > { %p4256_p7 = pneg %p4255_p3 }
  0x32   : > { %p4263_p6 = pnand %p4262_p5, %p4256_p7 }
  0x34   : > { %4266 = shalt.err (!%p4263_p6)
}
  0x35   : > { %s5180_s30 = smov 64   ;;  %s5181_s16 = smov 4  }
  0x36   : > { %4000 = dma.hbm_to_vmem [thread:$0]  (!%p4546_p8), %s5198_s13, 1024, %s449_s26, [#allocation6], %s5180_s30, %s5180_s30, %s5181_s16  }
  0x37   : > { %s5199_s14 = sld [smem:[#allocation25_spill]] }
  0x3d   : > { %s4267_s25 = scalar_lea.hbm %s5199_s14, 16 }
  0x3e   : > { %p4268_p1 = scmp.ne.s32.totalorder %s5199_s14, %s4267_s25  ;;  %p4274_p6 = scmp.lt.u32.totalorder %s4267_s25, %s5199_s14 }
  0x40   : > { %p4270_p4 = pnand %p4268_p1, %p4241_p10 }
  0x42   : > { %p4271_p5 = pneg %p4270_p4 }
  0x44   : > { %p4276_p9 = pnand %p4274_p6, %p4271_p5 }
  0x46   : > { %4279 = shalt.err (!%p4276_p9)
}
  0x47   : > { %s4280_s26 = scalar_lea.vmem %s4550_s29, 16  ;;  %s4287_s12 = scalar_lea.vmem %s4550_s29, 32 }
  0x48   : > { %p4281_p11 = scmp.ne.s32.totalorder %s4550_s29, %s4280_s26  ;;  %p4288_p0 = scmp.lt.s32.totalorder %s4550_s29, %s4550_s29 }
  0x49   : > { %p4289_p2 = scmp.lt.s32.totalorder %s4287_s12, %s4280_s26 }
  0x4a   : > { %p4283_p12 = pnand %p4281_p11, %p4241_p10 }
  0x4b   : > { %p4290_p3 = por %p4289_p2, %p4288_p0 }
  0x4c   : > { %p4284_p13 = pneg %p4283_p12 }
  0x4e   : > { %p4291_p7 = pnand %p4290_p3, %p4284_p13 }
  0x50   : > { %4294 = shalt.err (!%p4291_p7)
}
  0x51   : > { %4003 = dma.hbm_to_vmem [thread:$0]  (!%p4546_p8), %s5199_s14, 16, %s4550_s29, [#allocation9]  }
  0x52   : > { %s4604_s0 = sadd.s32 1, %s4401_s21   ;;  %s216_s27 = sadd.s32 1, %s4397_s20 }
  0x53   : > { %s213_s15 = ssub.s32 %s4401_s21, %s4604_s0  ;;  %p223_p10 = scmp.ne.s32.totalorder %s4397_s20, %s4393_s19 }
  0x54   : > { %p214_p1 = scmp.eq.s32.totalorder %s213_s15, 0  ;;  %p224_p4 = scmp.eq.s32.totalorder %s4401_s21, 0 }
  0x55   : > { %p4013_p5 = scmp.lt.s32.totalorder %s4401_s21, 2  ;;  %s514_s17 = sand.u32 1, %s4397_s20  }
  0x56   : > { %s4615_s18 = scalar_select %p214_p1, %s4397_s20, %s216_s27  }
  0x57   : > { %p225_p6 = por %p224_p4, %p223_p10  ;;  %s4617_s25 = sshll.u32 %s514_s17, 7 }
  0x58   : > { %5200 = sst [smem:[#allocation14_spill]] %s4615_s18  ;;  %s5182_s28 = sshll.u32 %s4401_s21, 11 }
  0x59   : > { %s5201_s7 = sld [smem:[#allocation19_spill]]  ;;  %s518_s10 = scalar_lea.vmem [#allocation3], %s4617_s25 }
  0x5a   : > { %s525_s11 = sshll.u32 %s518_s10, 4  ;;  %p4628_p8 = pnand %p4013_p5, %p225_p6  ;;  %s4632_s11 = int_to_ptr.vmem [resolvable:$true] %s525_s11 }
  0x5b   : > { %s4634_s15 = scalar_lea.sflag [#allocation4], %s514_s17 }
  0x5c   : > { %p4297_p11 = pneg %p4628_p8 }
  0x5f   : > { %s4625_s12 = scalar_lea.hbm %s5201_s7, %s5182_s28  ;;  %s4300_s10 = scalar_lea.hbm %s5201_s7, 4096 }
  0x60   : > { %s4295_s30 = scalar_lea.hbm %s4625_s12, 2048  ;;  %p4301_p0 = scmp.lt.u32.totalorder %s4625_s12, %s5201_s7 }
  0x61   : > { %p4296_p9 = scmp.ne.s32.totalorder %s4625_s12, %s4295_s30  ;;  %p4302_p2 = scmp.lt.u32.totalorder %s4300_s10, %s4295_s30 }
  0x62   : > { %p4304_p7 = scmp.lt.u32.totalorder %s4295_s30, %s4625_s12 }
  0x63   : > { %p4298_p12 = pnand %p4297_p11, %p4296_p9  ;;  %p4303_p3 = por %p4302_p2, %p4301_p0 }
  0x65   : > { %p4299_p13 = pneg %p4298_p12  ;;  %p4305_p10 = por %p4304_p7, %p4303_p3 }
  0x67   : > { %p4306_p1 = pnand %p4305_p10, %p4299_p13 }
  0x69   : > { %4309 = shalt.err (!%p4306_p1)
}
  0x6a   : > { %s4310_s17 = scalar_lea.vmem %s4632_s11, 2048  ;;  %s4407_s26 = smov [#allocation3]  }
  0x6b   : > { %p4311_p4 = scmp.ne.s32.totalorder %s4632_s11, %s4310_s17  ;;  %s4315_s29 = sshll.u32 %s4407_s26, 4  ;;  %s4316_s29 = int_to_ptr.vmem [resolvable:$false] %s4315_s29 }
  0x6c   : > { %s4317_s16 = scalar_lea.vmem %s4316_s29, 4096  ;;  %p4318_p9 = scmp.lt.s32.totalorder %s4632_s11, %s4316_s29 }
  0x6d   : > { %p4313_p5 = pnand %p4311_p4, %p4297_p11  ;;  %p4319_p12 = scmp.lt.s32.totalorder %s4317_s16, %s4310_s17 }
  0x6f   : > { %p4314_p6 = pneg %p4313_p5  ;;  %p4320_p0 = por %p4319_p12, %p4318_p9 }
  0x71   : > { %p4321_p2 = pnand %p4320_p0, %p4314_p6 }
  0x73   : > { %4324 = shalt.err (!%p4321_p2)
}
  0x74   : > { %s4408_s30 = smov 128   ;;  %s4409_s28 = smov 8  }
  0x75   : > { %4007 = dma.hbm_to_vmem [thread:$0]  (!%p4628_p8), %s4625_s12, 2048, %s4632_s11, %s4634_s15, %s4408_s30, %s4408_s30, %s4409_s28  }
  0x76   : > { %s5203_s10 = sshll.u32 %s4401_s21, 11  ;;  %s5204_s9 = sld [smem:[#allocation20_spill]] }
  0x77   : > { %s546_s29 = scalar_lea.vmem [#allocation5], %s4617_s25  ;;  %s542_s13 = sand.u32 1, %s4401_s21  }
  0x78   : > { %s553_s16 = sshll.u32 %s546_s29, 4  ;;  %s4673_s14 = scalar_lea.sflag [#allocation6], %s542_s13  ;;  %s4671_s16 = int_to_ptr.vmem [resolvable:$true] %s553_s16 }
  0x7c   : > { %s4667_s17 = scalar_lea.hbm %s5204_s9, %s5203_s10  ;;  %s4330_s11 = scalar_lea.hbm %s5204_s9, 4096 }
  0x7d   : > { %s4325_s18 = scalar_lea.hbm %s4667_s17, 2048  ;;  %p4331_p10 = scmp.lt.u32.totalorder %s4667_s17, %s5204_s9 }
  0x7e   : > { %p4326_p13 = scmp.ne.s32.totalorder %s4667_s17, %s4325_s18  ;;  %p4332_p1 = scmp.lt.u32.totalorder %s4330_s11, %s4325_s18 }
  0x7f   : > { %p4334_p5 = scmp.lt.u32.totalorder %s4325_s18, %s4667_s17 }
  0x80   : > { %p4328_p3 = pnand %p4326_p13, %p4297_p11  ;;  %p4333_p4 = por %p4332_p1, %p4331_p10 }
  0x82   : > { %p4329_p7 = pneg %p4328_p3  ;;  %p4335_p6 = por %p4334_p5, %p4333_p4 }
  0x84   : > { %p4336_p9 = pnand %p4335_p6, %p4329_p7 }
  0x86   : > { %4339 = shalt.err (!%p4336_p9)
}
  0x87   : > { %s4340_s13 = scalar_lea.vmem %s4671_s16, 2048  ;;  %s4410_s21 = smov [#allocation5]  }
  0x88   : > { %p4341_p12 = scmp.ne.s32.totalorder %s4671_s16, %s4340_s13  ;;  %s4345_s25 = sshll.u32 %s4410_s21, 4  ;;  %s4346_s25 = int_to_ptr.vmem [resolvable:$false] %s4345_s25 }
  0x89   : > { %s4347_s28 = scalar_lea.vmem %s4346_s25, 4096  ;;  %p4348_p13 = scmp.lt.s32.totalorder %s4671_s16, %s4346_s25 }
  0x8a   : > { %p4343_p0 = pnand %p4341_p12, %p4297_p11  ;;  %p4349_p3 = scmp.lt.s32.totalorder %s4347_s28, %s4340_s13 }
  0x8c   : > { %p4344_p2 = pneg %p4343_p0  ;;  %p4350_p10 = por %p4349_p3, %p4348_p13 }
  0x8e   : > { %p4351_p1 = pnand %p4350_p10, %p4344_p2 }
  0x90   : > { %4354 = shalt.err (!%p4351_p1)
}
  0x91   : > { %s5205_s18 = smov 4   ;;  %s5206_s10 = smov 64  }
  0x92   : > { %4010 = dma.hbm_to_vmem [thread:$0]  (!%p4628_p8), %s4667_s17, 2048, %s4671_s16, %s4673_s14, %s5206_s10, %s5206_s10, %s5205_s18  }
  0x93   : > { %p5207_p11 = scmp.ne.s32.totalorder %s5196_s24, 0 }
  0x94   : > { %s585_s26 = sand.u32 (!%p5207_p11), 1, %s4393_s19   ;;  %p5208_p7 = scmp.ne.s32.totalorder (!%p5207_p11), %s5195_s23, 0 }
  0x95   : > { %583 = sbr.rel (%p5207_p11) target bundleno = 5747 (0x1673), region = 80  ;;  %s3577_s29 = sshll.u32 (!%p5207_p11), %s585_s26, 7 }
  0x96   : > { %s586_s7 = scalar_lea.sflag (!%p5207_p11), [#allocation4], %s585_s26  ;;  %s4705_s12 = scalar_lea.vmem (!%p5207_p11), [#allocation3], %s3577_s29 }
  0x9c   : > { %4372 = dma.done.wait (%p5208_p7), %s586_s7, 2048  }
  0x9d   : > { %4374 = vsyncadd (%p5208_p7), %s586_s7, 4294965248  ;;  %s594_s27 = sand.u32 1, %s4525_s22   ;;  %s4712_s14 = scalar_lea.vmem [#allocation5], %s3577_s29 }
  0x9e   : > { %s595_s11 = scalar_lea.sflag [#allocation6], %s594_s27 }
  0x9f   : > { %4376 = dma.done.wait (%p5208_p7), %s595_s11, 2048  }
  0xa0   : > { %4378 = vsyncadd (%p5208_p7), %s595_s11, 4294965248  ;;  %p5209_p8 = scmp.eq.s32.totalorder %s4525_s22, 0 }
  0xa2   : > { %4380 = dma.done.wait (%p5209_p8), [#allocation6], 1024   ;;  %p5210_p4 = pmov %p5209_p8 }
  0xa4   : > { %4382 = vsyncadd (%p5210_p4), [#allocation6], 4294966272  ;;  %p5211_p5 = pmov %p5210_p4 }
  0xa5   : > { %p5212_p6 = pmov %p5210_p4 }
  0xa6   : > { %4384 = dma.done.wait (%p5211_p5), [#allocation9], 16  }
  0xa7   : > { %4386 = vsyncadd (%p5212_p6), [#allocation9], 4294967280  ;;  %p689_p9 = scmp.lt.s32.totalorder %s4525_s22, 1  ;;  %s5213_s3 = sld [smem:[#allocation18_spill]] }
  0xa8   : > { %s5214_s1 = sld [smem:[#allocation16_spill]]  ;;  %s5215_s2 = sld [smem:[#allocation17_spill]] }
  0xa9   : > { %s4728_s24 = scalar_select %p689_p9, %s4525_s22, 1 }
  0xaa   : > { %s5216_s26 = sld [smem:[#allocation21_spill]]  ;;  %p5219_p12 = scmp.ne.s32.totalorder %s4525_s22, 0 }
  0xab   : > { %s3983_s23 = smul.u32 192, %s4728_s24  ;;  %s3739_s17 = sshll.u32 %s4728_s24, 6 }
  0xac   : > { %s3984_s16 = smul.u32 3, %s4728_s24  ;;  %s3584_s21 = sshll.u32 %s4728_s24, 1 }
  0xad   : > { %s4736_s13 = scalar_lea.vmem %s5213_s3, %s3739_s17  ;;  %s711_s3 = scalar_lea.vmem %s5167_s6, %s4728_s24 }
  0xae   : > { %s4741_s28 = scalar_lea.vmem %s5214_s1, %s3983_s23  ;;  %s4750_s27 = scalar_lea.vmem %s5215_s2, %s3984_s16 }
  0xaf   : > { %s4764_s1 = scalar_lea.vmem %s5169_s8, %s3584_s21  ;;  %s5217_s2 = sld [smem:[#allocation22_spill]] }
  0xb0   : > { %s4770_s29 = scalar_lea.vmem %s5216_s26, %s4728_s24  ;;  %s5218_s17 = sld [smem:[#allocation23_spill]] }
  0xb1   : > { %729 = sbr.rel (%p5219_p12) target bundleno = 185 (0xb9), region = 100  ;;  %s5220_s25 = sld [smem:[#allocation15_spill]] (!%p5219_p12) }
  0xb5   : > { %s4776_s9 = scalar_lea.vmem %s5217_s2, %s4728_s24 }
  0xb6   : > { %s4782_s30 = scalar_lea.vmem %s5218_s17, %s4728_s24 }
  0xb7   : > { %v730_v0 = vld [vmem:[%s5220_s25] sm:$0x3f] (!%p5219_p12) }
  0xb8   : > { %731 = vst [vmem:[#allocation2] sm:$0x3f] %v730_v0 }
  0xb9 PF: > { %v4069_v1 = vld [vmem:[%s4741_s28 + $0x4] ss:$12 sps:$4 sm:$0xff]   ;;  %v4071_v2 = vld [vmem:[%s4741_s28] ss:$12 sps:$4 sm:$0xff]   ;;  %v4411_v3 = vmov 0   ;;  %v4412_v20 = vmov 0.0   ;;  %v768_v21 = vlaneseq  ;;  %s5221_s7 = scalar_lea.vmem %s5165_s4, %s4728_s24  ;;  %s5222_s21 = scalar_lea.vmem %s5166_s5, %s4728_s24 }
  0xba   : > { %943 = vmatprep.mubr.bf16.mxu1 %v4411_v3  ;;  %911 = vmatprep.subr.bf16.mxu1 %v4069_v1  ;;  %v4072_v4 = vld [vmem:[%s4741_s28 + $0x1c] ss:$12 sps:$4 sm:$0xff]   ;;  %v4074_v5 = vld [vmem:[%s4741_s28 + $0x18] ss:$12 sps:$4 sm:$0xff]   ;;  %v4075_v6 = vld [vmem:[%s4741_s28 + $0x34] ss:$12 sps:$4 sm:$0xff]  }
  0xbb   : > { %912 = vmatpush1.bf16.msra.mxu1 %v4071_v2  ;;  %v4077_v7 = vld [vmem:[%s4741_s28 + $0x30] ss:$12 sps:$4 sm:$0xff]   ;;  %v4078_v8 = vld [vmem:[%s4741_s28 + $0x4c] ss:$12 sps:$4 sm:$0xff]   ;;  %v4080_v9 = vld [vmem:[%s4741_s28 + $0x48] ss:$12 sps:$4 sm:$0xff]   ;;  %3863 = vmatprep.subr.mxu0 %v4412_v20 }
  0xbc   : > { %913 = vmatprep.subr.bf16.mxu1 %v4072_v4  ;;  %v4081_v10 = vld [vmem:[%s4741_s28 + $0x64] ss:$12 sps:$4 sm:$0xff]   ;;  %v4083_v11 = vld [vmem:[%s4741_s28 + $0x60] ss:$12 sps:$4 sm:$0xff]   ;;  %v4084_v12 = vld [vmem:[%s4741_s28 + $0x7c] ss:$12 sps:$4 sm:$0xff]  }
  0xbd   : > { %v4086_v13 = vld [vmem:[%s4741_s28 + $0x78] ss:$12 sps:$4 sm:$0xff]   ;;  %v4087_v14 = vld [vmem:[%s4741_s28 + $0x94] ss:$12 sps:$4 sm:$0xff]   ;;  %v4089_v15 = vld [vmem:[%s4741_s28 + $0x90] ss:$12 sps:$4 sm:$0xff]  }
  0xbe   : > { %v4090_v16 = vld [vmem:[%s4741_s28 + $0xac] ss:$12 sps:$4 sm:$0xff]   ;;  %v4092_v17 = vld [vmem:[%s4741_s28 + $0xa8] ss:$12 sps:$4 sm:$0xff]   ;;  %vm4413_vm0 = vmmov 0   ;;  %v4815_v22 = vshrl.u32 %v768_v21, 7 }
  0xbf   : > { %914 = vmatpush1.bf16.msra.mxu1 %v4074_v5  ;;  %v4805_v18 = vld [vmem:[#allocation2] sm:$0x3f]  ;;  %3865 = vmatprep.mubr.msk.f32.mxu0 %vm4413_vm0, %v4412_v20  ;;  %vm1022_vm1 = vcmask 130048   ;;  %s4414_s2 = smov 112   ;;  %v4093_v34 = vld [vmem:[%s4741_s28 + $0x8] ss:$12 sps:$4 sm:$0xff]  }
  0xc0   : > { %915 = vmatprep.subr.bf16.mxu1 %v4075_v6  ;;  %v733_v19 = vpack.c.bf16 %v4805_v18, %v4805_v18  ;;  %v4818_v23 = vsub.s32 1, %v4815_v22  ;;  %v4821_v24 = vld [vmem:[%s4750_s27] sm:$0x7]  ;;  %v4824_v25 = vsub.s32 0, %v4815_v22  ;;  %v4095_v36 = vld [vmem:[%s4741_s28 + $0x38] ss:$12 sps:$4 sm:$0xff]  }
  0xc1   : > { %v4094_v35 = vld [vmem:[%s4741_s28 + $0x20] ss:$12 sps:$4 sm:$0xff]   ;;  %v4096_v37 = vld [vmem:[%s4741_s28 + $0x50] ss:$12 sps:$4 sm:$0xff]   ;;  %v4097_v38 = vld [vmem:[%s4741_s28 + $0x68] ss:$12 sps:$4 sm:$0xff]  }
  0xc2   : > { %v775_v26 = vrot.slane %v4821_v24, %v4818_v23  ;;  %v771_v28 = vrot.slane %v4821_v24, %v4824_v25  ;;  %v4098_v39 = vld [vmem:[%s4741_s28 + $0x80] ss:$12 sps:$4 sm:$0xff]   ;;  %v4099_v40 = vld [vmem:[%s4741_s28 + $0x98] ss:$12 sps:$4 sm:$0xff]   ;;  %v4100_v41 = vld [vmem:[%s4741_s28 + $0xb0] ss:$12 sps:$4 sm:$0xff]  }
  0xc3   : > { %916 = vmatpush1.bf16.msra.mxu1 %v4077_v7  ;;  %v1007_v42 = vand.u32 127, %v768_v21  ;;  %v998_v44 = vand.u32 1, %v4815_v22  ;;  %v4415_v45 = vmov -1e+30   ;;  %vm1099_vm3 = vcmask 46080   ;;  %s4416_s28 = smov 96  }
  0xc4   : > { %917 = vmatprep.subr.bf16.mxu1 %v4078_v8  ;;  %v778_v56 = vsub.s32 2, %v4815_v22  ;;  %vm1115_vm4 = vcmask 1045504   ;;  %vm1111_vm5 = vcmask 48128   ;;  %s4417_s26 = smov 80   ;;  %s4418_s27 = smov 64   ;;  %vm2380_vm6 = vcmask 261120  }
  0xc5   : > { %v1012_v43 = vand.u32 1, %v1007_v42  ;;  %s4419_s15 = smov 48   ;;  %s4420_s18 = smov 32   ;;  %vm2382_vm7 = vcmask 392192   ;;  %vm2384_vm8 = vcmask 523264   ;;  %vm2386_vm9 = vcmask 654336  }
  0xc6   : > { %v779_v58 = vrot.slane %v4821_v24, %v778_v56  ;;  %s4421_s10 = smov 16   ;;  %vm2388_vm10 = vcmask 785408   ;;  %vm2390_vm11 = vcmask 916480   ;;  %p3653_p0 = scmp.eq.s32.totalorder %s4525_s22, 1 }
  0xc7   : > { %918 = vmatpush1.bf16.msra.mxu1 %v4080_v9  ;;  %vm1020_vm2 = vcmp.eq.s32.totalorder %v998_v44, %v1012_v43 }
  0xc8   : > { %919 = vmatprep.subr.bf16.mxu1 %v4081_v10  ;;  %v4864_v46 = vsel %vm1020_vm2, 0.0, %v4415_v45 }
  0xcb   : > { %920 = vmatpush1.bf16.msra.mxu1 %v4083_v11 }
  0xcc   : > { %921 = vmatprep.subr.bf16.mxu1 %v4084_v12 }
  0xcf   : > { %922 = vmatpush1.bf16.msra.mxu1 %v4086_v13 }
  0xd0   : > { %923 = vmatprep.subr.bf16.mxu1 %v4087_v14 }
  0xd3   : > { %924 = vmatpush1.bf16.msra.mxu1 %v4089_v15 }
  0xd4   : > { %925 = vmatprep.subr.bf16.mxu1 %v4090_v16 }
  0xd7   : > { %926 = vmatpush1.bf16.msra.mxu1 %v4092_v17 }
  0xd8   : > { %3843 = vmatprep.subr.bf16.mxu1 %v4412_v20 }
  0xda   : > { %944 = vmatmul.mubr.bf16.vlgmr.msra.gmra.mrb[0].mxu1 %v733_v19 }
  0xdb   : > { %3859 = vmatprep.mubr.msk.bf16.mxu1 %vm4413_vm0, %v4412_v20  ;;  %3844 = vmatpush3.bf16.msra.mxu1 %v4093_v34 }
  0xdc   : > { %3845 = vmatprep.subr.bf16.mxu1 %v4412_v20 }
  0xdf   : > { %3846 = vmatpush3.bf16.msra.mxu1 %v4094_v35 }
  0xe0   : > { %3847 = vmatprep.subr.bf16.mxu1 %v4412_v20 }
  0xe3   : > { %3848 = vmatpush3.bf16.msra.mxu1 %v4095_v36 }
  0xe4   : > { %3849 = vmatprep.subr.bf16.mxu1 %v4412_v20 }
  0xe7   : > { %3850 = vmatpush3.bf16.msra.mxu1 %v4096_v37 }
  0xe8   : > { %3851 = vmatprep.subr.bf16.mxu1 %v4412_v20 }
  0xeb   : > { %3852 = vmatpush3.bf16.msra.mxu1 %v4097_v38 }
  0xec   : > { %3853 = vmatprep.subr.bf16.mxu1 %v4412_v20 }
  0xef   : > { %3854 = vmatpush3.bf16.msra.mxu1 %v4098_v39 }
  0xf0   : > { %3855 = vmatprep.subr.bf16.mxu1 %v4412_v20 }
  0xf3   : > { %3856 = vmatpush3.bf16.msra.mxu1 %v4099_v40 }
  0xf4   : > { %3857 = vmatprep.subr.bf16.mxu1 %v4412_v20 }
  0xf7   : > { %3858 = vmatpush3.bf16.msra.mxu1 %v4100_v41 }
  0xf8   : > { %3908 = vmatprep.subr.mxu1 %v4412_v20 }
  0xfa   : > { %3860 = vmatmul.mubr.bf16.vlgmr.msra.gmra.mrb[4].mxu1 %v733_v19 }
  0xfb   : > { %3910 = vmatprep.mubr.msk.f32.mxu1 %vm4413_vm0, %v4412_v20 }
 0x1ad   : > { %v945_v27 = vpop.f32.mrb[0].mxu1 }
 0x1ae   : > { %v947_v29 = vpop.f32.mrb[1].mxu1  ;;  %v4836_v33 = vadd.f32 %v945_v27, %v771_v28 }
 0x1af   : > { %v4830_v30 = vadd.f32 %v947_v29, %v775_v26  ;;  %v949_v31 = vpop.f32.mrb[2].mxu1 }
 0x1b0   : > { %v950_v32 = vpop.f32.mrb[3].mxu1 }
 0x1b1   : > { %1191 = vrot.lane.b32.xlu1 %v4830_v30, %s4414_s2  ;;  %3864 = vmatpush3.xpose.msk.msra.mxu0 %vm1022_vm1, %v4830_v30 }
 0x1b2   : > { %3868 = vmatprep.subr.mxu0 %v4412_v20 }
 0x1b4   : > { %3866 = vmatmul.mubr.msk.f32.vlgmr.msra.gmra.mrb[0].mxu0 %vm1022_vm1, %v4836_v33 }
 0x1b5   : > { %1189 = vrot.lane.b32.xlu1 %v4836_v33, %s4414_s2  ;;  %3870 = vmatprep.mubr.msk.f32.mxu0 %vm4413_vm0, %v4412_v20 }
 0x1cd   : > { %v986_v57 = vpop.f32.mrb[4].mxu1 }
 0x1ce   : > { %v3861_v59 = vpop.f32.mrb[5].mxu1  ;;  %v4871_v61 = vadd.f32 %v986_v57, %v779_v58 }
 0x1cf   : > { %v989_v60 = vpop.f32.mrb[6].mxu1 }
 0x1d0   : > { %v3862_v62 = vpop.f32.mrb[7].mxu1  ;;  %3869 = vmatpush3.msk.msra.mxu0 %vm1115_vm4, %v4871_v61 }
 0x1d1   : > { %3873 = vmatprep.subr.mxu0 %v4412_v20 }
 0x223   : > { %v1192_v1 = vpop.permute.xlu1 %1191 }
 0x227   : > { %v1190_v3 = vpop.permute.xlu1 %1189 }
 0x287   : > { %v1095_v47 = vpop.f32.mrb[0].mxu0 }
 0x288   : > { %v1096_v48 = vadd.f32 %v1095_v47, %v4864_v46  ;;  %v3867_v49 = vpop.f32.mrb[1].mxu0 }
 0x28a   : > { %v1100_v50 = vsel %vm1099_vm3, %v1096_v48, -inf }
 0x28b   : > { %1101 = vmax.xlane.f32.xlu0 %v1100_v50 }
 0x318   : > { %v1102_v51 = vpop.xlane.xlu0 %1101 }
 0x319   : > { %v1103_v52 = vsub.f32 %v1096_v48, %v1102_v51 }
 0x31b   : > { %v1104_v53 = vmul.f32 1.442695, %v1103_v52 }
 0x31d   : > { %4109 = vpow2.f32 %v1104_v53 }
 0x327   : > { %v4110_v54 = vpop.eup %4109 }
 0x328   : > { %v1106_v55 = vsel %vm1099_vm3, %v4110_v54, 0.0 }
 0x329   : > { %1107 = vadd.xlane.f32.xlu0 %v1106_v55 }
 0x3b6   : > { %v1108_v63 = vpop.xlane.xlu0 %1107 }
 0x3b7   : > { %4111 = vrcp.f32 %v1108_v63 }
 0x3c1   : > { %v4112_v0 = vpop.eup %4111 }
 0x3c2   : > { %v1110_v2 = vmul.f32 %v4112_v0, %v4110_v54 }
 0x3c4   : > { %3871 = vmatmul.mubr.msk.f32.vlgmr.msra.gmra.mrb[2].mxu0 %vm1111_vm5, %v1110_v2 }
 0x3c5   : > { %3874 = vmatpush3.xpose.msk.msra.mxu0 %vm1022_vm1, %v1192_v1  ;;  %3875 = vmatprep.mubr.msk.f32.mxu0 %vm4413_vm0, %v4412_v20 }
 0x3c6   : > { %3878 = vmatprep.subr.mxu0 %v4412_v20 }
 0x3c8   : > { %3876 = vmatmul.mubr.msk.f32.vlgmr.msra.gmra.mrb[4].mxu0 %vm1022_vm1, %v1190_v3 }
 0x3c9   : > { %3880 = vmatprep.mubr.msk.f32.mxu0 %vm4413_vm0, %v4412_v20 }
 0x497   : > { %v4884_v4 = vpop.f32.mrb[2].mxu0 }
 0x498   : > { %v3872_v5 = vpop.f32.mrb[3].mxu0 }
 0x49b   : > { %v1263_v6 = vpop.f32.mrb[4].mxu0 }
 0x49c   : > { %v1264_v7 = vadd.f32 %v1263_v6, %v4864_v46  ;;  %v3877_v8 = vpop.f32.mrb[5].mxu0 }
 0x49e   : > { %v1267_v9 = vsel %vm1099_vm3, %v1264_v7, -inf }
 0x49f   : > { %1268 = vmax.xlane.f32.xlu0 %v1267_v9 }
 0x4b5   : > { %1278 = vrot.lane.b32.xlu0 %v4871_v61, %s4414_s2 }
 0x4b9   : > { %1357 = vrot.lane.b32.xlu0 %v4830_v30, %s4416_s28 }
 0x4bd   : > { %1355 = vrot.lane.b32.xlu0 %v4836_v33, %s4416_s28 }
 0x52c   : > { %v1269_v10 = vpop.xlane.xlu0 %1268 }
 0x52d   : > { %v1270_v11 = vsub.f32 %v1264_v7, %v1269_v10 }
 0x52f   : > { %v1271_v12 = vmul.f32 1.442695, %v1270_v11 }
 0x530   : > { %v1279_v13 = vpop.permute.xlu0 %1278 }
 0x531   : > { %4113 = vpow2.f32 %v1271_v12  ;;  %3879 = vmatpush3.msk.msra.mxu0 %vm1115_vm4, %v1279_v13 }
 0x532   : > { %3883 = vmatprep.subr.mxu0 %v4412_v20 }
 0x534   : > { %v1358_v19 = vpop.permute.xlu0 %1357 }
 0x538   : > { %v1356_v22 = vpop.permute.xlu0 %1355 }
 0x53b   : > { %v4114_v14 = vpop.eup %4113 }
 0x53c   : > { %v1273_v15 = vsel %vm1099_vm3, %v4114_v14, 0.0 }
 0x53d   : > { %1274 = vadd.xlane.f32.xlu1 %v1273_v15 }
 0x54e   : > { %1444 = vrot.lane.b32.xlu1 %v4871_v61, %s4416_s28 }
 0x552   : > { %1523 = vrot.lane.b32.xlu1 %v4830_v30, %s4417_s26 }
 0x5ca   : > { %v1275_v16 = vpop.xlane.xlu1 %1274 }
 0x5cb   : > { %4115 = vrcp.f32 %v1275_v16 }
 0x5ce   : > { %v1445_v24 = vpop.permute.xlu1 %1444 }
 0x5d2   : > { %v1524_v39 = vpop.permute.xlu1 %1523 }
 0x5d5   : > { %v4116_v17 = vpop.eup %4115 }
 0x5d6   : > { %v1277_v21 = vmul.f32 %v4116_v17, %v4114_v14 }
 0x5d8   : > { %3881 = vmatmul.mubr.msk.f32.vlgmr.msra.gmra.mrb[6].mxu0 %vm1111_vm5, %v1277_v21 }
 0x5d9   : > { %3884 = vmatpush3.xpose.msk.msra.mxu0 %vm1022_vm1, %v1358_v19  ;;  %3885 = vmatprep.mubr.msk.f32.mxu0 %vm4413_vm0, %v4412_v20 }
 0x5da   : > { %3888 = vmatprep.subr.mxu0 %v4412_v20 }
 0x5dc   : > { %3886 = vmatmul.mubr.msk.f32.vlgmr.msra.gmra.mrb[8].mxu0 %vm1022_vm1, %v1356_v22 }
 0x5dd   : > { %3889 = vmatpush3.msk.msra.mxu0 %vm1115_vm4, %v1445_v24  ;;  %3890 = vmatprep.mubr.msk.f32.mxu0 %vm4413_vm0, %v4412_v20 }
 0x5de   : > { %3893 = vmatprep.subr.mxu0 %v4412_v20 }
 0x6ab   : > { %v4911_v26 = vpop.f32.mrb[6].mxu0 }
 0x6ac   : > { %v3882_v27 = vpop.f32.mrb[7].mxu0 }
 0x6af   : > { %v1429_v28 = vpop.f32.mrb[8].mxu0 }
 0x6b0   : > { %v1430_v29 = vadd.f32 %v1429_v28, %v4864_v46  ;;  %v3887_v31 = vpop.f32.mrb[9].mxu0 }
 0x6b2   : > { %v1433_v32 = vsel %vm1099_vm3, %v1430_v29, -inf }
 0x6b3   : > { %1434 = vmax.xlane.f32.xlu0 %v1433_v32 }
 0x740   : > { %v1435_v34 = vpop.xlane.xlu0 %1434 }
 0x741   : > { %v1436_v35 = vsub.f32 %v1430_v29, %v1435_v34 }
 0x743   : > { %v1437_v36 = vmul.f32 1.442695, %v1436_v35 }
 0x745   : > { %4117 = vpow2.f32 %v1437_v36 }
 0x74f   : > { %v4118_v37 = vpop.eup %4117 }
 0x750   : > { %v1439_v38 = vsel %vm1099_vm3, %v4118_v37, 0.0 }
 0x751   : > { %1440 = vadd.xlane.f32.xlu1 %v1439_v38 }
 0x762   : > { %1521 = vrot.lane.b32.xlu1 %v4836_v33, %s4417_s26 }
 0x7de   : > { %v1441_v40 = vpop.xlane.xlu1 %1440 }
 0x7df   : > { %4119 = vrcp.f32 %v1441_v40 }
 0x7e2   : > { %v1522_v43 = vpop.permute.xlu1 %1521 }
 0x7e9   : > { %v4120_v41 = vpop.eup %4119 }
 0x7ea   : > { %v1443_v42 = vmul.f32 %v4120_v41, %v4118_v37 }
 0x7ec   : > { %3891 = vmatmul.mubr.msk.f32.vlgmr.msra.gmra.mrb[10].mxu0 %vm1111_vm5, %v1443_v42 }
 0x7ed   : > { %3894 = vmatpush3.xpose.msk.msra.mxu0 %vm1022_vm1, %v1524_v39  ;;  %3895 = vmatprep.mubr.msk.f32.mxu0 %vm4413_vm0, %v4412_v20 }
 0x7ee   : > { %3898 = vmatprep.subr.mxu0 %v4412_v20 }
 0x7f0   : > { %3896 = vmatmul.mubr.msk.f32.vlgmr.msra.gmra.mrb[12].mxu0 %vm1022_vm1, %v1522_v43 }
 0x7f1   : > { %3900 = vmatprep.mubr.msk.f32.mxu0 %vm4413_vm0, %v4412_v20 }
 0x8bf   : > { %v4926_v44 = vpop.f32.mrb[10].mxu0 }
 0x8c0   : > { %v3892_v45 = vpop.f32.mrb[11].mxu0 }
 0x8c3   : > { %v1595_v47 = vpop.f32.mrb[12].mxu0 }
 0x8c4   : > { %v1596_v48 = vadd.f32 %v1595_v47, %v4864_v46  ;;  %v3897_v49 = vpop.f32.mrb[13].mxu0 }
 0x8c6   : > { %v1599_v50 = vsel %vm1099_vm3, %v1596_v48, -inf }
 0x8c7   : > { %1600 = vmax.xlane.f32.xlu0 %v1599_v50 }
 0x8dd   : > { %1610 = vrot.lane.b32.xlu0 %v4871_v61, %s4417_s26 }
 0x8e1   : > { %1689 = vrot.lane.b32.xlu0 %v4830_v30, %s4418_s27 }
 0x8e5   : > { %1687 = vrot.lane.b32.xlu0 %v4836_v33, %s4418_s27 }
 0x8e9   : > { %1855 = vrot.lane.b32.xlu0 %v4830_v30, %s4419_s15 }
 0x8ed   : > { %2021 = vrot.lane.b32.xlu0 %v4830_v30, %s4420_s18 }
 0x8f1   : > { %2019 = vrot.lane.b32.xlu0 %v4836_v33, %s4420_s18 }
 0x8f5   : > { %2187 = vrot.lane.b32.xlu0 %v4830_v30, %s4421_s10 }
 0x8f9   : > { %2185 = vrot.lane.b32.xlu0 %v4836_v33, %s4421_s10 }
 0x954   : > { %v1601_v51 = vpop.xlane.xlu0 %1600 }
 0x955   : > { %v1602_v52 = vsub.f32 %v1596_v48, %v1601_v51 }
 0x957   : > { %v1603_v53 = vmul.f32 1.442695, %v1602_v52 }
 0x958   : > { %v1611_v54 = vpop.permute.xlu0 %1610 }
 0x959   : > { %4121 = vpow2.f32 %v1603_v53  ;;  %3899 = vmatpush3.msk.msra.mxu0 %vm1115_vm4, %v1611_v54 }
 0x95a   : > { %3903 = vmatprep.subr.mxu0 %v4412_v20 }
 0x95c   : > { %v1690_v30 = vpop.permute.xlu0 %1689 }
 0x960   : > { %v1688_v57 = vpop.permute.xlu0 %1687 }
 0x963   : > { %v4122_v55 = vpop.eup %4121 }
 0x964   : > { %v1605_v56 = vsel %vm1099_vm3, %v4122_v55, 0.0  ;;  %v1856_v59 = vpop.permute.xlu0 %1855 }
 0x965   : > { %1606 = vadd.xlane.f32.xlu1 %v1605_v56 }
 0x968   : > { %v2022_v62 = vpop.permute.xlu0 %2021 }
 0x96c   : > { %v2020_v0 = vpop.permute.xlu0 %2019 }
 0x970   : > { %v2188_v1 = vpop.permute.xlu0 %2187 }
 0x974   : > { %v2186_v2 = vpop.permute.xlu0 %2185 }
 0x976   : > { %1853 = vrot.lane.b32.xlu1 %v4836_v33, %s4419_s15 }
 0x9f2   : > { %v1607_v58 = vpop.xlane.xlu1 %1606 }
 0x9f3   : > { %4123 = vrcp.f32 %v1607_v58 }
 0x9f6   : > { %v1854_v33 = vpop.permute.xlu1 %1853 }
 0x9fd   : > { %v4124_v60 = vpop.eup %4123 }
 0x9fe   : > { %v1609_v63 = vmul.f32 %v4124_v60, %v4122_v55 }
 0xa00   : > { %3901 = vmatmul.mubr.msk.f32.vlgmr.msra.gmra.mrb[14].mxu0 %vm1111_vm5, %v1609_v63  ;;  %v4101_v63 = vld [vmem:[%s4736_s13] sm:$0xff]  }
 0xa01   : > { %3904 = vmatpush3.xpose.msk.msra.mxu0 %vm1022_vm1, %v1690_v30  ;;  %3905 = vmatprep.mubr.msk.f32.mxu0 %vm4413_vm0, %v4412_v20 }
 0xa02   : > { %3913 = vmatprep.subr.mxu0 %v4412_v20 }
 0xa04   : > { %3906 = vmatmul.mubr.msk.f32.vlgmr.msra.gmra.mrb[16].mxu0 %vm1022_vm1, %v1688_v57 }
 0xa05   : > { %3914 = vmatpush3.xpose.msk.msra.mxu0 %vm1022_vm1, %v1856_v59  ;;  %3915 = vmatprep.mubr.msk.f32.mxu0 %vm4413_vm0, %v4412_v20 }
 0xa06   : > { %3923 = vmatprep.subr.mxu0 %v4412_v20 }
 0xa08   : > { %3916 = vmatmul.mubr.msk.f32.vlgmr.msra.gmra.mrb[18].mxu0 %vm1022_vm1, %v1854_v33  ;;  %v4103_v33 = vld [vmem:[%s4736_s13 + $0x10] sm:$0xff]  }
 0xa09   : > { %3924 = vmatpush3.xpose.msk.msra.mxu0 %vm1022_vm1, %v2022_v62  ;;  %3925 = vmatprep.mubr.msk.f32.mxu0 %vm4413_vm0, %v4412_v20 }
 0xa0a   : > { %3933 = vmatprep.subr.mxu0 %v4412_v20 }
 0xa0c   : > { %3926 = vmatmul.mubr.msk.f32.vlgmr.msra.gmra.mrb[20].mxu0 %vm1022_vm1, %v2020_v0  ;;  %v4102_v0 = vld [vmem:[%s4736_s13 + $0x8] sm:$0xff]  }
 0xa0d   : > { %3934 = vmatpush3.xpose.msk.msra.mxu0 %vm1022_vm1, %v2188_v1  ;;  %3935 = vmatprep.mubr.msk.f32.mxu0 %vm4413_vm0, %v4412_v20  ;;  %v4104_v1 = vld [vmem:[%s4736_s13 + $0x18] sm:$0xff]  }
 0xa0e   : > { %3943 = vmatprep.subr.bf16.mxu0 %v4412_v20 }
 0xa10   : > { %3936 = vmatmul.mubr.msk.f32.vlgmr.msra.gmra.mrb[22].mxu0 %vm1022_vm1, %v2186_v2  ;;  %v4105_v2 = vld [vmem:[%s4736_s13 + $0x20] sm:$0xff]  }
 0xa11   : > { %3959 = vmatprep.mubr.msk.bf16.mxu0 %vm4413_vm0, %v4412_v20  ;;  %3944 = vmatpush3.bf16.msra.mxu0 %v4101_v63  ;;  %v4155_v63 = vld [vmem:[%s4705_s12 + $0x44] ss:$8 sps:$4 sm:$0xff] (!%p3653_p0)  }
 0xa12   : > { %3945 = vmatprep.subr.bf16.mxu0 %v4412_v20 }
 0xa15   : > { %3946 = vmatpush3.bf16.msra.mxu0 %v4102_v0  ;;  %v4167_v0 = vld [vmem:[%s4712_s14 + $0x40] sm:$0xff] (!%p3653_p0)  }
 0xa16   : > { %3947 = vmatprep.subr.bf16.mxu0 %v4412_v20 }
 0xa19   : > { %3948 = vmatpush3.bf16.msra.mxu0 %v4103_v33  ;;  %v4168_v33 = vld [vmem:[%s4712_s14] sm:$0xff] (!%p3653_p0)  }
 0xa1a   : > { %3949 = vmatprep.subr.bf16.mxu0 %v4412_v20 }
 0xa1d   : > { %3950 = vmatpush3.bf16.msra.mxu0 %v4104_v1  ;;  %v4157_v1 = vld [vmem:[%s4705_s12 + $0x40] ss:$8 sps:$4 sm:$0xff] (!%p3653_p0)  }
 0xa1e   : > { %3951 = vmatprep.subr.bf16.mxu0 %v4412_v20 }
 0xa21   : > { %3952 = vmatpush3.bf16.msra.mxu0 %v4105_v2  ;;  %v4169_v2 = vld [vmem:[%s4712_s14 + $0x48] sm:$0xff] (!%p3653_p0)  }
 0xa22   : > { %3953 = vmatprep.subr.bf16.mxu0 %v4412_v20 }
 0xad3   : > { %v1683_v3 = vpop.f32.mrb[14].mxu0 }
 0xad4   : > { %v3902_v5 = vpop.f32.mrb[15].mxu0 }
 0xad5   : > { %v4107_v5 = vld [vmem:[%s4736_s13 + $0x30] sm:$0xff]  }
 0xad7   : > { %v1761_v6 = vpop.f32.mrb[16].mxu0 }
 0xad8   : > { %v1762_v7 = vadd.f32 %v1761_v6, %v4864_v46  ;;  %v3907_v8 = vpop.f32.mrb[17].mxu0  ;;  %v4108_v6 = vld [vmem:[%s4736_s13 + $0x38] sm:$0xff]  }
 0xada   : > { %v1765_v9 = vsel %vm1099_vm3, %v1762_v7, -inf }
 0xadb   : > { %1766 = vmax.xlane.f32.xlu1 %v1765_v9  ;;  %v1927_v10 = vpop.f32.mrb[18].mxu0 }
 0xadc   : > { %v1928_v11 = vadd.f32 %v1927_v10, %v4864_v46  ;;  %v3917_v12 = vpop.f32.mrb[19].mxu0 }
 0xade   : > { %v1931_v13 = vsel %vm1099_vm3, %v1928_v11, -inf }
 0xadf   : > { %1932 = vmax.xlane.f32.xlu0 %v1931_v13  ;;  %v2093_v14 = vpop.f32.mrb[20].mxu0 }
 0xae0   : > { %v2094_v15 = vadd.f32 %v2093_v14, %v4864_v46  ;;  %v3927_v16 = vpop.f32.mrb[21].mxu0 }
 0xae2   : > { %v2097_v17 = vsel %vm1099_vm3, %v2094_v15, -inf }
 0xae3   : > { %2098 = vmax.xlane.f32.xlu0 %v2097_v17  ;;  %v2259_v19 = vpop.f32.mrb[22].mxu0 }
 0xae4   : > { %v2260_v21 = vadd.f32 %v2259_v19, %v4864_v46  ;;  %v3937_v22 = vpop.f32.mrb[23].mxu0 }
 0xae6   : > { %v2263_v24 = vsel %vm1099_vm3, %v2260_v21, -inf }
 0xae7   : > { %2264 = vmax.xlane.f32.xlu0 %v2263_v24 }
 0xaec   : > { %1776 = vrot.lane.b32.xlu1 %v4871_v61, %s4418_s27 }
 0xb68   : > { %v1767_v27 = vpop.xlane.xlu1 %1766 }
 0xb69   : > { %v1768_v28 = vsub.f32 %v1762_v7, %v1767_v27 }
 0xb6b   : > { %v1769_v29 = vmul.f32 1.442695, %v1768_v28 }
 0xb6c   : > { %v1777_v31 = vpop.permute.xlu1 %1776  ;;  %v1933_v32 = vpop.xlane.xlu0 %1932 }
 0xb6d   : > { %4125 = vpow2.f32 %v1769_v29  ;;  %v1934_v34 = vsub.f32 %v1928_v11, %v1933_v32  ;;  %3909 = vmatpush3.msk.msra.mxu1 %vm1115_vm4, %v1777_v31 }
 0xb6e   : > { %3918 = vmatprep.subr.mxu1 %v4412_v20 }
 0xb6f   : > { %v1935_v35 = vmul.f32 1.442695, %v1934_v34 }
 0xb70   : > { %v2099_v46 = vpop.xlane.xlu0 %2098 }
 0xb71   : > { %4127 = vpow2.f32 %v1935_v35  ;;  %v2100_v36 = vsub.f32 %v2094_v15, %v2099_v46 }
 0xb73   : > { %v2101_v37 = vmul.f32 1.442695, %v2100_v36 }
 0xb74   : > { %v2265_v38 = vpop.xlane.xlu0 %2264 }
 0xb75   : > { %4129 = vpow2.f32 %v2101_v37  ;;  %v2266_v39 = vsub.f32 %v2260_v21, %v2265_v38 }
 0xb77   : > { %v4126_v40 = vpop.eup %4125  ;;  %v2267_v41 = vmul.f32 1.442695, %v2266_v39 }
 0xb78   : > { %v1771_v42 = vsel %vm1099_vm3, %v4126_v40, 0.0 }
 0xb79   : > { %4131 = vpow2.f32 %v2267_v41  ;;  %1772 = vadd.xlane.f32.xlu1 %v1771_v42 }
 0xb7b   : > { %v4128_v43 = vpop.eup %4127 }
 0xb7c   : > { %v1937_v45 = vsel %vm1099_vm3, %v4128_v43, 0.0 }
 0xb7d   : > { %1938 = vadd.xlane.f32.xlu0 %v1937_v45 }
 0xb7f   : > { %v4130_v47 = vpop.eup %4129 }
 0xb80   : > { %v2103_v48 = vsel %vm1099_vm3, %v4130_v47, 0.0 }
 0xb81   : > { %2104 = vadd.xlane.f32.xlu1 %v2103_v48 }
 0xb83   : > { %v4132_v49 = vpop.eup %4131 }
 0xb84   : > { %v2269_v50 = vsel %vm1099_vm3, %v4132_v49, 0.0 }
 0xb85   : > { %2270 = vadd.xlane.f32.xlu0 %v2269_v50 }
 0xb92   : > { %2108 = vrot.lane.b32.xlu1 %v4871_v61, %s4420_s18 }
 0xb96   : > { %2274 = vrot.lane.b32.xlu1 %v4871_v61, %s4421_s10 }
 0xb9a   : > { %2352 = vrot.lane.b32.xlu1 %v4911_v26, %s4421_s10 }
 0xb9b   : > { %1942 = vrot.lane.b32.xlu0 %v4871_v61, %s4419_s15 }
 0xb9e   : > { %2360 = vrot.lane.b32.xlu1 %v1683_v3, %s4419_s15  ;;  %v4106_v3 = vld [vmem:[%s4736_s13 + $0x28] sm:$0xff]  }
 0xb9f   : > { %2356 = vrot.lane.b32.xlu0 %v4926_v44, %s4420_s18  ;;  %3954 = vmatpush3.bf16.msra.mxu0 %v4106_v3  ;;  %v4170_v3 = vld [vmem:[%s4712_s14 + $0x8] sm:$0xff] (!%p3653_p0)  }
 0xba0   : > { %3955 = vmatprep.subr.bf16.mxu0 %v4412_v20 }
 0xba3   : > { %3956 = vmatpush3.bf16.msra.mxu0 %v4107_v5  ;;  %v4171_v5 = vld [vmem:[%s4712_s14 + $0x50] sm:$0xff] (!%p3653_p0)  }
 0xba4   : > { %3957 = vmatprep.subr.bf16.mxu0 %v4412_v20 }
 0xba7   : > { %3958 = vmatpush3.bf16.msra.mxu0 %v4108_v6  ;;  %v4158_v6 = vld [vmem:[%s4705_s12 + $0x54] ss:$8 sps:$4 sm:$0xff] (!%p3653_p0)  }
 0xc06   : > { %v1773_v51 = vpop.xlane.xlu1 %1772 }
 0xc07   : > { %4133 = vrcp.f32 %v1773_v51 }
 0xc0a   : > { %v1939_v52 = vpop.xlane.xlu0 %1938 }
 0xc0b   : > { %4135 = vrcp.f32 %v1939_v52 }
 0xc0e   : > { %v2105_v53 = vpop.xlane.xlu1 %2104 }
 0xc0f   : > { %4137 = vrcp.f32 %v2105_v53 }
 0xc11   : > { %v4134_v54 = vpop.eup %4133 }
 0xc12   : > { %v1775_v55 = vmul.f32 %v4134_v54, %v4126_v40  ;;  %v2271_v56 = vpop.xlane.xlu0 %2270  ;;  %v2109_v30 = vpop.permute.xlu1 %2108  ;;  %v3652_v54 = vld [vmem:[%s711_s3] ss:$0 sm:$0xff] }
 0xc13   : > { %4139 = vrcp.f32 %v2271_v56 }
 0xc14   : > { %3911 = vmatmul.mubr.msk.f32.vlgmr.msra.gmra.mrb[8].mxu1 %vm1111_vm5, %v1775_v55 }
 0xc15   : > { %v4136_v26 = vpop.eup %4135  ;;  %3920 = vmatprep.mubr.msk.f32.mxu1 %vm4413_vm0, %v4412_v20 }
 0xc16   : > { %v1941_v61 = vmul.f32 %v4136_v26, %v4128_v43  ;;  %v1943_v57 = vpop.permute.xlu0 %1942  ;;  %v2275_v59 = vpop.permute.xlu1 %2274  ;;  %v4143_v26 = vld [vmem:[%s4705_s12 + $0x4] ss:$8 sps:$4 sm:$0xff] (!%p3653_p0)  }
 0xc17   : > { %3919 = vmatpush3.msk.msra.mxu1 %vm1115_vm4, %v1943_v57  ;;  %2648 = vmatprep.subr.bf16.mxu0 (!%p3653_p0), %v4143_v26  ;;  %v4146_v57 = vld [vmem:[%s4705_s12 + $0x14] ss:$8 sps:$4 sm:$0xff] (!%p3653_p0)  }
 0xc18   : > { %3921 = vmatmul.mubr.msk.f32.vlgmr.msra.gmra.mrb[10].mxu1 %vm1111_vm5, %v1941_v61  ;;  %3928 = vmatprep.subr.mxu1 %v4412_v20  ;;  %v4145_v61 = vld [vmem:[%s4705_s12] ss:$8 sps:$4 sm:$0xff] (!%p3653_p0)  }
 0xc19   : > { %v4138_v44 = vpop.eup %4137  ;;  %3929 = vmatpush3.msk.msra.mxu1 %vm1115_vm4, %v2109_v30  ;;  %3930 = vmatprep.mubr.msk.f32.mxu1 %vm4413_vm0, %v4412_v20  ;;  %v4422_v30 = vmov (!%p3653_p0), 0  }
 0xc1a   : > { %v2107_v58 = vmul.f32 %v4138_v44, %v4130_v47  ;;  %3938 = vmatprep.subr.mxu1 %v4412_v20  ;;  %v2353_v15 = vpop.permute.xlu1 %2352  ;;  %v4148_v44 = vld [vmem:[%s4705_s12 + $0x10] ss:$8 sps:$4 sm:$0xff] (!%p3653_p0)  }
 0xc1b   : > { %v2379_v17 = vsel %vm1022_vm1, %v4884_v4, %v2353_v15  ;;  %v3642_v4 = vld [vmem:[%s5221_s7] ss:$0 sm:$0xff]  ;;  %v4176_v15 = vld [vmem:[%s4712_s14 + $0x20] sm:$0xff] (!%p3653_p0)  }
 0xc1c   : > { %3931 = vmatmul.mubr.msk.f32.vlgmr.msra.gmra.mrb[12].mxu1 %vm1111_vm5, %v2107_v58  ;;  %v4149_v58 = vld [vmem:[%s4705_s12 + $0x24] ss:$8 sps:$4 sm:$0xff] (!%p3653_p0)  }
 0xc1d   : > { %v4140_v60 = vpop.eup %4139  ;;  %3939 = vmatpush3.msk.msra.mxu1 %vm1115_vm4, %v2275_v59  ;;  %3940 = vmatprep.mubr.msk.f32.mxu1 %vm4413_vm0, %v4412_v20  ;;  %v2357_v20 = vpop.permute.xlu0 %2356  ;;  %v4151_v59 = vld [vmem:[%s4705_s12 + $0x20] ss:$8 sps:$4 sm:$0xff] (!%p3653_p0)  }
 0xc1e   : > { %v2273_v62 = vmul.f32 %v4140_v60, %v4132_v49  ;;  %v2361_v16 = vpop.permute.xlu1 %2360  ;;  %v2381_v21 = vsel %vm2380_vm6, %v2379_v17, %v2357_v20  ;;  %v4152_v60 = vld [vmem:[%s4705_s12 + $0x34] ss:$8 sps:$4 sm:$0xff] (!%p3653_p0)   ;;  %3790 = vmatprep.subr.bf16.mxu1 (!%p3653_p0), %v4167_v0  ;;  %v4166_v20 = vld [vmem:[%s4705_s12 + $0x70] ss:$8 sps:$4 sm:$0xff] (!%p3653_p0)  }
 0xc1f   : > { %v2383_v24 = vsel %vm2382_vm7, %v2381_v21, %v2361_v16  ;;  %v4177_v16 = vld [vmem:[%s4712_s14 + $0x68] sm:$0xff] (!%p3653_p0)   ;;  %v4179_v21 = vld [vmem:[%s4712_s14 + $0x70] sm:$0xff] (!%p3653_p0)  }
 0xc20   : > { %3941 = vmatmul.mubr.msk.f32.vlgmr.msra.gmra.mrb[14].mxu1 %vm1111_vm5, %v2273_v62  ;;  %v4154_v62 = vld [vmem:[%s4705_s12 + $0x30] ss:$8 sps:$4 sm:$0xff] (!%p3653_p0)  }
 0xc21   : > { %3791 = vmatpush3.bf16.msra.mxu1 (!%p3653_p0), %v4168_v33 }
 0xc22   : > { %3792 = vmatprep.subr.bf16.mxu1 (!%p3653_p0), %v4169_v2 }
 0xc25   : > { %3793 = vmatpush3.bf16.msra.mxu1 (!%p3653_p0), %v4170_v3 }
 0xc26   : > { %3794 = vmatprep.subr.bf16.mxu1 (!%p3653_p0), %v4171_v5 }
 0xce7   : > { %v1849_v7 = vpop.f32.mrb[8].mxu1 }
 0xce8   : > { %v3912_v8 = vpop.f32.mrb[9].mxu1  ;;  %2364 = vrot.lane.b32.xlu0 %v1849_v7, %s4418_s27  ;;  %v4160_v7 = vld [vmem:[%s4705_s12 + $0x50] ss:$8 sps:$4 sm:$0xff] (!%p3653_p0)  }
 0xce9   : > { %v4172_v8 = vld [vmem:[%s4712_s14 + $0x10] sm:$0xff] (!%p3653_p0)  }
 0xcea   : > { %3795 = vmatpush3.bf16.msra.mxu1 (!%p3653_p0), %v4172_v8 }
 0xceb   : > { %v2015_v9 = vpop.f32.mrb[10].mxu1 }
 0xcec   : > { %2368 = vrot.lane.b32.xlu1 %v2015_v9, %s4417_s26  ;;  %v3922_v10 = vpop.f32.mrb[11].mxu1  ;;  %v4173_v9 = vld [vmem:[%s4712_s14 + $0x58] sm:$0xff] (!%p3653_p0)  }
 0xced   : > { %v4161_v10 = vld [vmem:[%s4705_s12 + $0x64] ss:$8 sps:$4 sm:$0xff] (!%p3653_p0)   ;;  %3796 = vmatprep.subr.bf16.mxu1 (!%p3653_p0), %v4173_v9 }
 0xcef   : > { %v2181_v11 = vpop.f32.mrb[12].mxu1 }
 0xcf0   : > { %2372 = vrot.lane.b32.xlu0 %v2181_v11, %s4416_s28  ;;  %v3932_v12 = vpop.f32.mrb[13].mxu1  ;;  %v4163_v11 = vld [vmem:[%s4705_s12 + $0x60] ss:$8 sps:$4 sm:$0xff] (!%p3653_p0)  }
 0xcf1   : > { %v4164_v12 = vld [vmem:[%s4705_s12 + $0x74] ss:$8 sps:$4 sm:$0xff] (!%p3653_p0)  }
 0xcf3   : > { %v2347_v13 = vpop.f32.mrb[14].mxu1 }
 0xcf4   : > { %2376 = vrot.lane.b32.xlu1 %v2347_v13, %s4414_s2  ;;  %v3942_v14 = vpop.f32.mrb[15].mxu1  ;;  %v4174_v13 = vld [vmem:[%s4712_s14 + $0x18] sm:$0xff] (!%p3653_p0)  }
 0xcf5   : > { %v4175_v14 = vld [vmem:[%s4712_s14 + $0x60] sm:$0xff] (!%p3653_p0)   ;;  %3797 = vmatpush3.bf16.msra.mxu1 (!%p3653_p0), %v4174_v13 }
 0xcf6   : > { %3798 = vmatprep.subr.bf16.mxu1 (!%p3653_p0), %v4175_v14 }
 0xcf9   : > { %3799 = vmatpush3.bf16.msra.mxu1 (!%p3653_p0), %v4176_v15 }
 0xcfa   : > { %3800 = vmatprep.subr.bf16.mxu1 (!%p3653_p0), %v4177_v16 }
 0xd5a   : > { %v2365_v19 = vpop.permute.xlu0 %2364 }
 0xd5b   : > { %v2385_v28 = vsel %vm2384_vm8, %v2383_v24, %v2365_v19  ;;  %v4178_v19 = vld [vmem:[%s4712_s14 + $0x28] sm:$0xff] (!%p3653_p0)   ;;  %v4181_v24 = vld [vmem:[%s4712_s14 + $0x78] sm:$0xff] (!%p3653_p0)  }
 0xd5c   : > { %3801 = vmatpush3.bf16.msra.mxu1 (!%p3653_p0), %v4178_v19 }
 0xd5d   : > { %3802 = vmatprep.subr.bf16.mxu1 (!%p3653_p0), %v4179_v21 }
 0xd5e   : > { %v2369_v22 = vpop.permute.xlu1 %2368 }
 0xd5f   : > { %v2387_v29 = vsel %vm2386_vm9, %v2385_v28, %v2369_v22  ;;  %v4180_v22 = vld [vmem:[%s4712_s14 + $0x30] sm:$0xff] (!%p3653_p0)   ;;  %v2556_v28 = vld [vmem:[%s4764_s1] sm:$0x3] (!%p3653_p0) }
 0xd60   : > { %3803 = vmatpush3.bf16.msra.mxu1 (!%p3653_p0), %v4180_v22 }
 0xd61   : > { %3804 = vmatprep.subr.bf16.mxu1 (!%p3653_p0), %v4181_v24 }
 0xd62   : > { %v2373_v27 = vpop.permute.xlu0 %2372 }
 0xd63   : > { %v2389_v31 = vsel %vm2388_vm10, %v2387_v29, %v2373_v27  ;;  %v4182_v27 = vld [vmem:[%s4712_s14 + $0x38] sm:$0xff] (!%p3653_p0)   ;;  %v2561_v29 = vrot.slane (!%p3653_p0), %v2556_v28, %v4824_v25 }
 0xd64   : > { %3805 = vmatpush3.bf16.msra.mxu1 (!%p3653_p0), %v4182_v27 }
 0xd66   : > { %v2377_v32 = vpop.permute.xlu1 %2376 }
 0xd67   : > { %v2391_v34 = vsel %vm2390_vm11, %v2389_v31, %v2377_v32  ;;  %v2565_v31 = vrot.slane (!%p3653_p0), %v2556_v28, %v4818_v23 }
 0xd68   : > { %v2392_v35 = vpack.c.bf16 %v2391_v34, %v2391_v34 }
 0xd6a   : > { %3960 = vmatmul.mubr.bf16.vlgmr.msra.gmra.mrb[24].mxu0 %v2392_v35 }
 0xd6b   : > { %2680 = vmatprep.mubr.bf16.mxu0 (!%p3653_p0), %v4422_v30  ;;  %2649 = vmatpush1.bf16.msra.mxu0 (!%p3653_p0), %v4145_v61 }
 0xd6c   : > { %2650 = vmatprep.subr.bf16.mxu0 (!%p3653_p0), %v4146_v57 }
 0xd6f   : > { %2651 = vmatpush1.bf16.msra.mxu0 (!%p3653_p0), %v4148_v44  ;;  %v3687_v44 = vld [vmem:[%s4776_s9] ss:$0 sm:$0xff] (!%p3653_p0) }
 0xd70   : > { %2652 = vmatprep.subr.bf16.mxu0 (!%p3653_p0), %v4149_v58 }
 0xd73   : > { %2653 = vmatpush1.bf16.msra.mxu0 (!%p3653_p0), %v4151_v59  ;;  %v3688_v59 = vld [vmem:[%s4782_s30] ss:$0 sm:$0xff] (!%p3653_p0) }
 0xd74   : > { %2654 = vmatprep.subr.bf16.mxu0 (!%p3653_p0), %v4152_v60 }
 0xd77   : > { %2655 = vmatpush1.bf16.msra.mxu0 (!%p3653_p0), %v4154_v62 }
 0xd78   : > { %2656 = vmatprep.subr.bf16.mxu0 (!%p3653_p0), %v4155_v63 }
 0xd7b   : > { %2657 = vmatpush1.bf16.msra.mxu0 (!%p3653_p0), %v4157_v1 }
 0xd7c   : > { %2658 = vmatprep.subr.bf16.mxu0 (!%p3653_p0), %v4158_v6 }
 0xd7f   : > { %2659 = vmatpush1.bf16.msra.mxu0 (!%p3653_p0), %v4160_v7 }
 0xd80   : > { %2660 = vmatprep.subr.bf16.mxu0 (!%p3653_p0), %v4161_v10 }
 0xd83   : > { %2661 = vmatpush1.bf16.msra.mxu0 (!%p3653_p0), %v4163_v11 }
 0xd84   : > { %2662 = vmatprep.subr.bf16.mxu0 (!%p3653_p0), %v4164_v12 }
 0xd87   : > { %2663 = vmatpush1.bf16.msra.mxu0 (!%p3653_p0), %v4166_v20 }
 0xe3d   : > { %v2498_v46 = vpop.f32.mrb[24].mxu0 }
 0xe3e   : > { %v2499_v36 = vadd.f32 %v3642_v4, %v2498_v46  ;;  %v3961_v37 = vpop.f32.mrb[25].mxu0 }
 0xe3f   : > { %v2501_v38 = vpop.f32.mrb[26].mxu0 }
 0xe40   : > { %v3962_v39 = vpop.f32.mrb[27].mxu0  ;;  %v2504_v40 = vadd.f32 %v2499_v36, %v4805_v18  ;;  %v3651_v18 = vld [vmem:[%s5222_s21] ss:$0 sm:$0xff] }
 0xe42   : > { %v2507_v41 = vsel %vm1115_vm4, %v2504_v40, 0.0 }
 0xe43   : > { %2508 = vadd.xlane.f32.xlu0 %v2507_v41 }
 0xed0   : > { %v2509_v42 = vpop.xlane.xlu0 %2508 }
 0xed1   : > { %v2511_v43 = vmul.f32 0.0078125, %v2509_v42 }
 0xed3   : > { %v2512_v45 = vsub.f32 %v2504_v40, %v2511_v43  ;;  %v3670_v43 = vld [vmem:[%s4770_s29] ss:$0 sm:$0xff] (!%p3653_p0) }
 0xed5   : > { %v2513_v47 = vmul.f32 %v2512_v45, %v2512_v45 }
 0xed7   : > { %v2514_v48 = vsel %vm1115_vm4, %v2513_v47, 0.0 }
 0xed8   : > { %2515 = vadd.xlane.f32.xlu1 %v2514_v48 }
 0xf65   : > { %v2516_v49 = vpop.xlane.xlu1 %2515 }
 0xf66   : > { %v2517_v50 = vmul.f32 0.0078125, %v2516_v49 }
 0xf68   : > { %v2518_v51 = vadd.f32 1e-05, %v2517_v50 }
 0xf6a   : > { %4141 = vrsqrt.f32 %v2518_v51 }
 0xf73   : > { %2538 = sbr.rel (%p3653_p0) target bundleno = 4718 (0x126e), region = 104 }
 0xf74   : > { %v4142_v52 = vpop.eup %4141 }
 0xf75   : > { %v2520_v53 = vmul.f32 %v4142_v52, %v2512_v45 }
 0xf77   : > { %v2527_v55 = vmul.f32 %v3651_v18, %v2520_v53 }
 0xf79   : > { %v5055_v56 = vadd.f32 %v3652_v54, %v2527_v55 }
 0xf7b   : > { %v2539_v17 = vpack.c.bf16 %v5055_v56, %v5055_v56 }
 0xf7d   : > { %2681 = vmatmul.mubr.bf16.vlgmr.msra.gmra.mrb[0].mxu0 %v2539_v17 }
0x1050   : > { %v2682_v32 = vpop.f32.mrb[0].mxu0 }
0x1051   : > { %v2683_v34 = vadd.f32 %v2682_v32, %v2561_v29  ;;  %v2684_v35 = vpop.f32.mrb[1].mxu0 }
0x1052   : > { %v2685_v4 = vadd.f32 %v2684_v35, %v2565_v31  ;;  %v2686_v46 = vpop.f32.mrb[2].mxu0 }
0x1053   : > { %v2689_v36 = vmax.f32 %v2683_v34, 0.0  ;;  %v2687_v37 = vpop.f32.mrb[3].mxu0 }
0x1054   : > { %v2690_v38 = vmax.f32 %v2685_v4, 0.0 }
0x1055   : > { %v2691_v40 = vpack.c.bf16 %v2689_v36, %v2689_v36 }
0x1056   : > { %v2692_v39 = vpack.c.bf16 %v2690_v38, %v2690_v38 }
0x1058   : > { %2860 = vmatprep.mubr.bf16.mxu1 %v2692_v39 }
0x1059   : > { %2861 = vmatmul.mubr.bf16.vlgmr.msra.gmra.mrb[0].mxu1 %v2691_v40 }
0x112c   : > { %v3806_v41 = vpop.f32.mrb[0].mxu1 }
0x112d   : > { %v3807_v42 = vpop.f32.mrb[1].mxu1 }
0x112e   : > { %v3808_v45 = vadd.f32 %v3807_v42, %v3806_v41  ;;  %v3809_v47 = vpop.f32.mrb[2].mxu1 }
0x112f   : > { %v3810_v48 = vpop.f32.mrb[3].mxu1 }
0x1130   : > { %v2863_v49 = vadd.f32 %v3808_v45, %v3670_v43 }
0x1132   : > { %v2868_v50 = vadd.f32 %v2863_v49, %v5055_v56 }
0x1134   : > { %v2871_v51 = vsel %vm1115_vm4, %v2868_v50, 0.0 }
0x1135   : > { %2872 = vadd.xlane.f32.xlu0 %v2871_v51 }
0x11c2   : > { %v2873_v52 = vpop.xlane.xlu0 %2872 }
0x11c3   : > { %v2874_v18 = vmul.f32 0.0078125, %v2873_v52 }
0x11c5   : > { %v2875_v53 = vsub.f32 %v2868_v50, %v2874_v18 }
0x11c7   : > { %v2876_v54 = vmul.f32 %v2875_v53, %v2875_v53 }
0x11c9   : > { %v2877_v55 = vsel %vm1115_vm4, %v2876_v54, 0.0 }
0x11ca   : > { %2878 = vadd.xlane.f32.xlu0 %v2877_v55 }
0x1257   : > { %v2879_v26 = vpop.xlane.xlu0 %2878 }
0x1258   : > { %v2880_v61 = vmul.f32 0.0078125, %v2879_v26 }
0x125a   : > { %v2881_v30 = vadd.f32 1e-05, %v2880_v61 }
0x125c   : > { %4183 = vrsqrt.f32 %v2881_v30 }
0x1266   : > { %v4184_v57 = vpop.eup %4183 }
0x1267   : > { %v2883_v58 = vmul.f32 %v4184_v57, %v2875_v53 }
0x1269   : > { %v2890_v60 = vmul.f32 %v3687_v44, %v2883_v58 }
0x126b   : > { %v2897_v62 = vadd.f32 %v3688_v59, %v2890_v60 }
0x126d   : > { %2898 = vst [vmem:[#allocation2] sm:$0x3f] %v2897_v62 }
0x126e PF: > { %p3689_p2 = scmp.ne.s32.totalorder %s4525_s22, 1 }
0x126f   : > { %v4185_v63 = vld [vmem:[%s4705_s12 + $0x4] ss:$8 sps:$4 sm:$0xff] (!%p3689_p2)   ;;  %v4187_v0 = vld [vmem:[%s4705_s12] ss:$8 sps:$4 sm:$0xff] (!%p3689_p2)   ;;  %v4423_v33 = vmov (!%p3689_p2), 0   ;;  %v4213_v14 = vld [vmem:[%s4712_s14 + $0x50] sm:$0xff] (!%p3689_p2)   ;;  %v2903_v34 = vpack.c.bf16 (!%p3689_p2), %v5055_v56, %v5055_v56 }
0x1270   : > { %2902 = sbr.rel (%p3689_p2) target bundleno = 5747 (0x1673), region = 108  ;;  %3044 = vmatprep.mubr.bf16.mxu0 (!%p3689_p2), %v4423_v33  ;;  %3012 = vmatprep.subr.bf16.mxu0 (!%p3689_p2), %v4185_v63  ;;  %v4188_v1 = vld [vmem:[%s4705_s12 + $0x14] ss:$8 sps:$4 sm:$0xff] (!%p3689_p2)   ;;  %v4190_v2 = vld [vmem:[%s4705_s12 + $0x10] ss:$8 sps:$4 sm:$0xff] (!%p3689_p2)   ;;  %v4209_v9 = vld [vmem:[%s4712_s14 + $0x40] sm:$0xff] (!%p3689_p2)  }
0x1271   : > { %3013 = vmatpush1.bf16.msra.mxu0 (!%p3689_p2), %v4187_v0  ;;  %v4191_v3 = vld [vmem:[%s4705_s12 + $0x24] ss:$8 sps:$4 sm:$0xff] (!%p3689_p2)   ;;  %v4193_v5 = vld [vmem:[%s4705_s12 + $0x20] ss:$8 sps:$4 sm:$0xff] (!%p3689_p2)   ;;  %v4194_v6 = vld [vmem:[%s4705_s12 + $0x34] ss:$8 sps:$4 sm:$0xff] (!%p3689_p2)   ;;  %3812 = vmatprep.subr.bf16.mxu1 (!%p3689_p2), %v4209_v9 }
0x1272   : > { %3014 = vmatprep.subr.bf16.mxu0 (!%p3689_p2), %v4188_v1  ;;  %v4196_v7 = vld [vmem:[%s4705_s12 + $0x30] ss:$8 sps:$4 sm:$0xff] (!%p3689_p2)   ;;  %v4197_v8 = vld [vmem:[%s4705_s12 + $0x44] ss:$8 sps:$4 sm:$0xff] (!%p3689_p2)   ;;  %v4199_v11 = vld [vmem:[%s4705_s12 + $0x40] ss:$8 sps:$4 sm:$0xff] (!%p3689_p2)  }
0x1273   : > { %v4210_v10 = vld [vmem:[%s4712_s14] sm:$0xff] (!%p3689_p2)   ;;  %v4211_v12 = vld [vmem:[%s4712_s14 + $0x48] sm:$0xff] (!%p3689_p2)   ;;  %v4200_v15 = vld [vmem:[%s4705_s12 + $0x54] ss:$8 sps:$4 sm:$0xff] (!%p3689_p2)   ;;  %vm3235_vm12 = vcmask (!%p3689_p2), 1041408   ;;  %v4424_v57 = vmov (!%p3689_p2), 0.0  }
0x1274   : > { %3813 = vmatpush3.bf16.msra.mxu1 (!%p3689_p2), %v4210_v10  ;;  %v4212_v13 = vld [vmem:[%s4712_s14 + $0x8] sm:$0xff] (!%p3689_p2)   ;;  %v4202_v20 = vld [vmem:[%s4705_s12 + $0x50] ss:$8 sps:$4 sm:$0xff] (!%p3689_p2)   ;;  %v4206_v22 = vld [vmem:[%s4705_s12 + $0x74] ss:$8 sps:$4 sm:$0xff] (!%p3689_p2)   ;;  %vm4425_vm13 = vmmov (!%p3689_p2), 0  }
0x1275   : > { %3015 = vmatpush1.bf16.msra.mxu0 (!%p3689_p2), %v4190_v2  ;;  %3814 = vmatprep.subr.bf16.mxu1 (!%p3689_p2), %v4211_v12  ;;  %v4214_v16 = vld [vmem:[%s4712_s14 + $0x10] sm:$0xff] (!%p3689_p2)   ;;  %v4215_v17 = vld [vmem:[%s4712_s14 + $0x58] sm:$0xff] (!%p3689_p2)   ;;  %v4203_v19 = vld [vmem:[%s4705_s12 + $0x64] ss:$8 sps:$4 sm:$0xff] (!%p3689_p2)   ;;  %s5223_s22 = sld [smem:[#allocation26_spill]] (!%p3689_p2) }
0x1276   : > { %3016 = vmatprep.subr.bf16.mxu0 (!%p3689_p2), %v4191_v3  ;;  %v4205_v21 = vld [vmem:[%s4705_s12 + $0x60] ss:$8 sps:$4 sm:$0xff] (!%p3689_p2)   ;;  %v4216_v24 = vld [vmem:[%s4712_s14 + $0x18] sm:$0xff] (!%p3689_p2)   ;;  %v4221_v35 = vld [vmem:[%s4712_s14 + $0x70] sm:$0xff] (!%p3689_p2)  }
0x1277   : > { %v4217_v27 = vld [vmem:[%s4712_s14 + $0x60] sm:$0xff]   ;;  %v4208_v29 = vld [vmem:[%s4705_s12 + $0x70] ss:$8 sps:$4 sm:$0xff]   ;;  %v4219_v31 = vld [vmem:[%s4712_s14 + $0x68] sm:$0xff]  }
0x1278   : > { %3815 = vmatpush3.bf16.msra.mxu1 %v4212_v13  ;;  %v4218_v28 = vld [vmem:[%s4712_s14 + $0x20] sm:$0xff]   ;;  %v4220_v32 = vld [vmem:[%s4712_s14 + $0x28] sm:$0xff]   ;;  %v4222_v4 = vld [vmem:[%s4712_s14 + $0x30] sm:$0xff]  }
0x1279   : > { %3017 = vmatpush1.bf16.msra.mxu0 %v4193_v5  ;;  %3816 = vmatprep.subr.bf16.mxu1 %v4213_v14  ;;  %v4223_v46 = vld [vmem:[%s4712_s14 + $0x78] sm:$0xff]   ;;  %v4225_v30 = vld [vmem:[#allocation7] sm:$0xff]   ;;  %v4226_v44 = vld [vmem:[#allocation7 + $0x8] sm:$0xff]  }
0x127a   : > { %3018 = vmatprep.subr.bf16.mxu0 %v4194_v6  ;;  %v4224_v36 = vld [vmem:[%s4712_s14 + $0x38] sm:$0xff]   ;;  %v4227_v0 = vld [vmem:[#allocation7 + $0x10] sm:$0xff]   ;;  %v4229_v33 = vld [vmem:[#allocation7 + $0x20] sm:$0xff]  }
0x127b   : > { %v2920_v37 = vld [vmem:[%s4764_s1] sm:$0x3]  ;;  %v4230_v1 = vld [vmem:[#allocation7 + $0x28] sm:$0xff]   ;;  %v4231_v2 = vld [vmem:[#allocation7 + $0x30] sm:$0xff]  }
0x127c   : > { %3817 = vmatpush3.bf16.msra.mxu1 %v4214_v16  ;;  %v2925_v38 = vrot.slane %v2920_v37, %v4824_v25  ;;  %v2929_v39 = vrot.slane %v2920_v37, %v4818_v23  ;;  %v3706_v53 = vld [vmem:[%s4770_s29] ss:$0 sm:$0xff] }
0x127d   : > { %3019 = vmatpush1.bf16.msra.mxu0 %v4196_v7  ;;  %3818 = vmatprep.subr.bf16.mxu1 %v4215_v17  ;;  %v4232_v3 = vld [vmem:[#allocation7 + $0x38] sm:$0xff]  }
0x127e   : > { %3020 = vmatprep.subr.bf16.mxu0 %v4197_v8  ;;  %v3723_v9 = vld [vmem:[%s4776_s9] ss:$0 sm:$0xff] }
0x1280   : > { %3819 = vmatpush3.bf16.msra.mxu1 %v4216_v24 }
0x1281   : > { %3021 = vmatpush1.bf16.msra.mxu0 %v4199_v11  ;;  %3820 = vmatprep.subr.bf16.mxu1 %v4217_v27  ;;  %v3724_v11 = vld [vmem:[%s4782_s30] ss:$0 sm:$0xff] }
0x1282   : > { %3022 = vmatprep.subr.bf16.mxu0 %v4200_v15  ;;  %v3725_v15 = vld [vmem:[#allocation8] ss:$0 sm:$0xff] }
0x1284   : > { %3821 = vmatpush3.bf16.msra.mxu1 %v4218_v28 }
0x1285   : > { %3023 = vmatpush1.bf16.msra.mxu0 %v4202_v20  ;;  %3822 = vmatprep.subr.bf16.mxu1 %v4219_v31 }
0x1286   : > { %3024 = vmatprep.subr.bf16.mxu0 %v4203_v19 }
0x1288   : > { %3823 = vmatpush3.bf16.msra.mxu1 %v4220_v32 }
0x1289   : > { %3025 = vmatpush1.bf16.msra.mxu0 %v4205_v21  ;;  %3824 = vmatprep.subr.bf16.mxu1 %v4221_v35 }
0x128a   : > { %3026 = vmatprep.subr.bf16.mxu0 %v4206_v22 }
0x128c   : > { %3825 = vmatpush3.bf16.msra.mxu1 %v4222_v4 }
0x128d   : > { %3027 = vmatpush1.bf16.msra.mxu0 %v4208_v29  ;;  %3826 = vmatprep.subr.bf16.mxu1 %v4223_v46 }
0x128e   : > { %3963 = vmatprep.subr.bf16.mxu0 %v4424_v57 }
0x1290   : > { %3045 = vmatmul.mubr.bf16.vlgmr.msra.gmra.mrb[0].mxu0 %v2903_v34  ;;  %3827 = vmatpush3.bf16.msra.mxu1 %v4224_v36 }
0x1291   : > { %3964 = vmatpush3.bf16.msra.mxu0 %v4225_v30  ;;  %3979 = vmatprep.mubr.msk.bf16.mxu0 %vm4425_vm13, %v4424_v57 }
0x1292   : > { %3965 = vmatprep.subr.bf16.mxu0 %v4424_v57 }
0x1295   : > { %3966 = vmatpush3.bf16.msra.mxu0 %v4226_v44 }
0x1296   : > { %3967 = vmatprep.subr.bf16.mxu0 %v4424_v57 }
0x1299   : > { %3968 = vmatpush3.bf16.msra.mxu0 %v4227_v0 }
0x129a   : > { %3969 = vmatprep.subr.bf16.mxu0 %v4424_v57 }
0x1363   : > { %v3046_v40 = vpop.f32.mrb[0].mxu0 }
0x1364   : > { %v3047_v41 = vadd.f32 %v3046_v40, %v2925_v38  ;;  %v3048_v42 = vpop.f32.mrb[1].mxu0 }
0x1365   : > { %v3049_v43 = vadd.f32 %v3048_v42, %v2929_v39  ;;  %v3050_v45 = vpop.f32.mrb[2].mxu0 }
0x1366   : > { %v3053_v47 = vmax.f32 %v3047_v41, 0.0  ;;  %v3051_v48 = vpop.f32.mrb[3].mxu0 }
0x1367   : > { %v3054_v49 = vmax.f32 %v3049_v43, 0.0 }
0x1368   : > { %v3055_v51 = vpack.c.bf16 %v3053_v47, %v3053_v47 }
0x1369   : > { %v3056_v50 = vpack.c.bf16 %v3054_v49, %v3054_v49 }
0x136b   : > { %3224 = vmatprep.mubr.bf16.mxu1 %v3056_v50 }
0x136c   : > { %3225 = vmatmul.mubr.bf16.vlgmr.msra.gmra.mrb[0].mxu1 %v3055_v51 }
0x143f   : > { %v3828_v52 = vpop.f32.mrb[0].mxu1 }
0x1440   : > { %v3829_v18 = vpop.f32.mrb[1].mxu1 }
0x1441   : > { %v3830_v54 = vadd.f32 %v3829_v18, %v3828_v52  ;;  %v3831_v25 = vpop.f32.mrb[2].mxu1 }
0x1442   : > { %v3832_v55 = vpop.f32.mrb[3].mxu1 }
0x1443   : > { %v3227_v26 = vadd.f32 %v3830_v54, %v3706_v53 }
0x1445   : > { %v3232_v23 = vadd.f32 %v3227_v26, %v5055_v56  ;;  %v4228_v56 = vld [vmem:[#allocation7 + $0x18] sm:$0xff]  }
0x1446   : > { %3970 = vmatpush3.bf16.msra.mxu0 %v4228_v56 }
0x1447   : > { %v3236_v61 = vsel %vm3235_vm12, %v3232_v23, 0.0  ;;  %3971 = vmatprep.subr.bf16.mxu0 %v4424_v57 }
0x1448   : > { %3237 = vadd.xlane.f32.xlu0 %v3236_v61 }
0x144a   : > { %3972 = vmatpush3.bf16.msra.mxu0 %v4229_v33 }
0x144b   : > { %3973 = vmatprep.subr.bf16.mxu0 %v4424_v57 }
0x144e   : > { %3974 = vmatpush3.bf16.msra.mxu0 %v4230_v1 }
0x144f   : > { %3975 = vmatprep.subr.bf16.mxu0 %v4424_v57 }
0x1452   : > { %3976 = vmatpush3.bf16.msra.mxu0 %v4231_v2 }
0x1453   : > { %3977 = vmatprep.subr.bf16.mxu0 %v4424_v57 }
0x1456   : > { %3978 = vmatpush3.bf16.msra.mxu0 %v4232_v3 }
0x14d5   : > { %v3238_v58 = vpop.xlane.xlu0 %3237 }
0x14d6   : > { %v3239_v59 = vmul.f32 0.0078125, %v3238_v58 }
0x14d8   : > { %v3240_v60 = vsub.f32 %v3232_v23, %v3239_v59 }
0x14da   : > { %v3241_v62 = vmul.f32 %v3240_v60, %v3240_v60 }
0x14dc   : > { %v3242_v63 = vsel %vm3235_vm12, %v3241_v62, 0.0 }
0x14dd   : > { %3243 = vadd.xlane.f32.xlu0 %v3242_v63 }
0x156a   : > { %v3244_v5 = vpop.xlane.xlu0 %3243 }
0x156b   : > { %v3245_v6 = vmul.f32 0.0078125, %v3244_v5 }
0x156d   : > { %v3246_v7 = vadd.f32 1e-05, %v3245_v6 }
0x156f   : > { %4233 = vrsqrt.f32 %v3246_v7 }
0x1579   : > { %v4234_v8 = vpop.eup %4233 }
0x157a   : > { %v3248_v10 = vmul.f32 %v4234_v8, %v3240_v60 }
0x157c   : > { %v3255_v12 = vmul.f32 %v3723_v9, %v3248_v10 }
0x157e   : > { %v3262_v13 = vadd.f32 %v3724_v11, %v3255_v12 }
0x1580   : > { %v3263_v14 = vpack.c.bf16 %v3262_v13, %v3262_v13 }
0x1582   : > { %3980 = vmatmul.mubr.bf16.vlgmr.msra.gmra.mrb[4].mxu0 %v3263_v14 }
0x1655   : > { %v3369_v20 = vpop.f32.mrb[4].mxu0 }
0x1656   : > { %v3370_v16 = vadd.f32 %v3725_v15, %v3369_v20  ;;  %v3981_v17 = vpop.f32.mrb[5].mxu0 }
0x1657   : > { %v3372_v19 = vpop.f32.mrb[6].mxu0 }
0x1658   : > { %v3734_v21 = vmul.f32 -1.442695, %v3370_v16  ;;  %v3982_v22 = vpop.f32.mrb[7].mxu0 }
0x165a   : > { %4235 = vpow2.f32 %v3734_v21 }
0x1664   : > { %v4236_v24 = vpop.eup %4235 }
0x1665   : > { %v3378_v27 = vadd.f32 1.0, %v4236_v24 }
0x1667   : > { %4237 = vrcp.f32 %v3378_v27 }
0x1671   : > { %v4238_v28 = vpop.eup %4237 }
0x1672   : > { %3381 = vst [vmem:[%s5223_s22] sm:$0x3] %v4238_v28 }
0x1673 PF: > { %s5224_s12 = sld [smem:[#allocation14_spill]]  ;;  %p29_p13 = scmp.ge.s32.totalorder %s4604_s0, 4  }
0x1674   : > { %s5225_s18 = smov %s4393_s19  ;;  %s5226_s19 = smov %s4397_s20 }
0x1675   : > { %s5228_s21 = smov %s4604_s0  ;;  %31 = sbr.rel (!%p29_p13) target bundleno = 19 (0x13), region = 179 }
0x1679   : > { %s5227_s20 = smov %s5224_s12 }
0x167c   :  { %3393 = vsyncpa [#allocation4], 1 }
0x167d   :  { %3395 = vsyncpa [#allocation4 + $0x1], 1 }
0x167e   :  { %3396 = vsyncpa [#allocation6], 1 }
0x167f   :  { %3398 = vsyncpa [#allocation6 + $0x1], 1 }
0x1680   :  { %3399 = vsyncpa [#allocation9], 1 }

</bundles_post_ra>
